<compile_context>
chip_gen: v7x
topology: tpu7x:2x2x1
jax: 0.10.0
libtpu: 0.0.40
codegen_flags: <defaults>
</compile_context>

<pallas_src>
import functools
import math

import jax
import jax.numpy as jnp
from jax.experimental import pallas as pl
from jax.experimental.pallas import tpu as pltpu


def _round_up(x, m):
    return pl.cdiv(x, m) * m


def _residual_ln_ffn_kernel(x_ref, g_ref, bt_ref, w1_ref, b1_ref, w2_ref,
                            b2_ref, o_ref, xn_sc, acc_sc, *, d_true, eps):
    """One (tm, d_pad) row tile; grid axis 1 chunks the hidden dimension."""
    k = pl.program_id(1)
    n_k = pl.num_programs(1)

    @pl.when(k == 0)
    def _init():
        # LayerNorm over the *true* feature count (padded lanes are zeros and
        # are masked out of the variance; gamma/beta pads are zero so the
        # normalized pad lanes come out exactly 0).
        x = x_ref[...].astype(jnp.float32)
        col = jax.lax.broadcasted_iota(jnp.int32, x.shape, 1)
        valid = col < d_true
        mean = jnp.sum(x, axis=-1, keepdims=True) * (1.0 / d_true)
        diff = jnp.where(valid, x - mean, 0.0)
        var = jnp.sum(diff * diff, axis=-1, keepdims=True) * (1.0 / d_true)
        inv_std = jax.lax.rsqrt(var + eps)
        xn_sc[...] = (diff * inv_std * g_ref[...].astype(jnp.float32)
                      + bt_ref[...].astype(jnp.float32))
        acc_sc[...] = jnp.zeros_like(acc_sc)

    # FFN on this hidden chunk. Operands go to the MXU in the weight dtype
    # (no f32 upcast of bf16 weights); accumulation is f32.
    h = jnp.dot(xn_sc[...].astype(w1_ref.dtype), w1_ref[...],
                preferred_element_type=jnp.float32)
    h = h + b1_ref[...].astype(jnp.float32)
    # Exact erf-based GELU (torch.nn.GELU() default), in f32.
    h = 0.5 * h * (1.0 + jax.lax.erf(h * (1.0 / math.sqrt(2.0))))
    acc_sc[...] += jnp.dot(h.astype(w2_ref.dtype), w2_ref[...],
                           preferred_element_type=jnp.float32)

    @pl.when(k == n_k - 1)
    def _finalize():
        y = (acc_sc[...]
             + b2_ref[...].astype(jnp.float32)
             + x_ref[...].astype(jnp.float32))          # residual add
        o_ref[...] = y.astype(o_ref.dtype)


def residual_layernorm_ffn(x, gamma, beta, w1, b1, w2, b2, *,
                           tm=256, tk=512, eps=1e-5):
    """y = x + Linear2(GELU(Linear1(LayerNorm(x)))).

    x: (B, S, dim). Weights are stored pre-transposed:
      w1: (dim, hidden), b1: (hidden,), w2: (hidden, dim), b2: (dim,).
    """
    B, S, dim = x.shape
    hidden = w1.shape[1]
    assert w1.shape == (dim, hidden) and w2.shape == (hidden, dim)
    M = B * S

    # ---- wrapper-side padding so every block divides exactly ---------------
    d_pad = _round_up(dim, 128)                 # lane-dense loads/stores
    tk = _round_up(min(tk, _round_up(hidden, 128)), 128)   # hidden chunk
    h_pad = _round_up(hidden, tk)
    tm = max(8, tm)
    m_pad = _round_up(M, tm)

    x2d = jnp.pad(x.reshape(M, dim), ((0, m_pad - M), (0, d_pad - dim)))
    g2d = jnp.pad(gamma, (0, d_pad - dim)).reshape(1, d_pad)
    bt2d = jnp.pad(beta, (0, d_pad - dim)).reshape(1, d_pad)
    w1p = jnp.pad(w1, ((0, d_pad - dim), (0, h_pad - hidden)))
    b1p = jnp.pad(b1, (0, h_pad - hidden)).reshape(1, h_pad)
    w2p = jnp.pad(w2, ((0, h_pad - hidden), (0, d_pad - dim)))
    b2p = jnp.pad(b2, (0, d_pad - dim)).reshape(1, d_pad)

    grid = (m_pad // tm, h_pad // tk)           # (rows: parallel, hidden: arbitrary)

    kernel = functools.partial(_residual_ln_ffn_kernel, d_true=dim, eps=eps)

    itemsize = jnp.dtype(x.dtype).itemsize
    cost = pl.CostEstimate(
        flops=4 * M * dim * hidden + 10 * M * dim,
        transcendentals=M * hidden + M,
        bytes_accessed=(x.size + w1.size + w2.size + M * dim) * itemsize
                       + 4 * (b1.size + b2.size + gamma.size + beta.size),
    )

    out2d = pl.pallas_call(
        kernel,
        out_shape=jax.ShapeDtypeStruct((m_pad, d_pad), x.dtype),
        grid_spec=pltpu.PrefetchScalarGridSpec(
            num_scalar_prefetch=0,
            grid=grid,
            in_specs=[
                pl.BlockSpec((tm, d_pad), lambda i, k: (i, 0)),    # x row tile
                pl.BlockSpec((1, d_pad), lambda i, k: (0, 0)),     # LN gamma
                pl.BlockSpec((1, d_pad), lambda i, k: (0, 0)),     # LN beta
                pl.BlockSpec((d_pad, tk), lambda i, k: (0, k)),    # W1 chunk
                pl.BlockSpec((1, tk), lambda i, k: (0, k)),        # b1 chunk
                pl.BlockSpec((tk, d_pad), lambda i, k: (k, 0)),    # W2 chunk
                pl.BlockSpec((1, d_pad), lambda i, k: (0, 0)),     # b2
            ],
            out_specs=pl.BlockSpec((tm, d_pad), lambda i, k: (i, 0)),
            scratch_shapes=[
                pltpu.VMEM((tm, d_pad), jnp.float32),   # cached LayerNorm(x)
                pltpu.VMEM((tm, d_pad), jnp.float32),   # f32 output accumulator
            ],
        ),
        compiler_params=pltpu.CompilerParams(
            dimension_semantics=("parallel", "arbitrary"),
            vmem_limit_bytes=64 * 1024 * 1024,
        ),
        cost_estimate=cost,
    )(x2d, g2d, bt2d, w1p, b1p, w2p, b2p)

    return out2d[:M, :dim].reshape(B, S, dim)


def init_params(key, dim, hidden_dim_multiplier, input_dim_multiplier=1):
    """Mimics nn.Linear default init (uniform +/- 1/sqrt(fan_in)); transposed."""
    input_dim = int(dim * input_dim_multiplier)
    hidden_dim = int(dim * hidden_dim_multiplier)
    k1, k2, k3, k4 = jax.random.split(key, 4)

    bound1 = 1.0 / math.sqrt(input_dim)
    w1 = jax.random.uniform(k1, (input_dim, hidden_dim), jnp.float32,
                            minval=-bound1, maxval=bound1)
    b1 = jax.random.uniform(k2, (hidden_dim,), jnp.float32,
                            minval=-bound1, maxval=bound1)

    bound2 = 1.0 / math.sqrt(hidden_dim)
    w2 = jax.random.uniform(k3, (hidden_dim, dim), jnp.float32,
                            minval=-bound2, maxval=bound2)
    b2 = jax.random.uniform(k4, (dim,), jnp.float32,
                            minval=-bound2, maxval=bound2)
    return w1, b1, w2, b2


if __name__ == "__main__":
    # Module config: dim=32, hidden_dim_multiplier=4 -> hidden=128,
    # dropout=0.1 (identity in eval), normalization=LayerNorm(dim).
    dim = 32
    hidden_mult = 4
    B, S = 2, 8

    key = jax.random.PRNGKey(0)
    kx, kg, kb, kp = jax.random.split(key, 4)
    x = jax.random.normal(kx, (B, S, dim), dtype=jnp.float32)

    # LayerNorm affine params (PyTorch default is ones/zeros; use non-trivial
    # values here so the check exercises them).
    gamma = 1.0 + 0.1 * jax.random.normal(kg, (dim,), dtype=jnp.float32)
    beta = 0.1 * jax.random.normal(kb, (dim,), dtype=jnp.float32)

    w1, b1, w2, b2 = init_params(kp, dim, hidden_mult)

    out = residual_layernorm_ffn(x, gamma, beta, w1, b1, w2, b2)
    out = jax.block_until_ready(out)

    # Pure-JAX reference: y = x + FFN(LayerNorm(x)), exact-erf GELU.
    x2 = x.reshape(-1, dim).astype(jnp.float32)
    mean = x2.mean(-1, keepdims=True)
    var = jnp.mean((x2 - mean) ** 2, axis=-1, keepdims=True)
    xn = (x2 - mean) / jnp.sqrt(var + 1e-5) * gamma + beta
    h = xn @ w1 + b1
    h = 0.5 * h * (1.0 + jax.lax.erf(h / math.sqrt(2.0)))
    y = h @ w2 + b2
    ref = (x2 + y).reshape(B, S, dim)

    assert out.shape == (B, S, dim)
    err = float(jnp.max(jnp.abs(out - ref)))
    assert jnp.allclose(out, ref, atol=1e-4, rtol=1e-4), err

    print("KERNEL_OK")
</pallas_src>

<mosaic_0001>
module attributes {stable_mosaic.version = 11 : i64} {
  func.func @_residual_ln_ffn_kernel(%arg0: i32, %arg1: i32, %arg2: memref<256x128xf32, #tpu.memory_space<vmem>>, %arg3: memref<1x128xf32, #tpu.memory_space<vmem>>, %arg4: memref<1x128xf32, #tpu.memory_space<vmem>>, %arg5: memref<128x128xf32, #tpu.memory_space<vmem>>, %arg6: memref<1x128xf32, #tpu.memory_space<vmem>>, %arg7: memref<128x128xf32, #tpu.memory_space<vmem>>, %arg8: memref<1x128xf32, #tpu.memory_space<vmem>>, %arg9: memref<256x128xf32, #tpu.memory_space<vmem>>, %arg10: memref<256x128xf32, #tpu.memory_space<vmem>>, %arg11: memref<256x128xf32, #tpu.memory_space<vmem>>) attributes {dimension_semantics = [#tpu.dimension_semantics<parallel>, #tpu.dimension_semantics<arbitrary>], iteration_bounds = array<i64: 1, 1>, scalar_prefetch = 0 : i64, scratch_operands = 2 : i64, tpu.core_type = #tpu.core_type<tc>, window_params = [{transform_indices = @transform_0, window_bounds = array<i64: 256, 128>}, {pipeline_mode = #tpu.pipeline_mode<synchronous>, transform_indices = @transform_1, window_bounds = array<i64: 1, 128>}, {pipeline_mode = #tpu.pipeline_mode<synchronous>, transform_indices = @transform_2, window_bounds = array<i64: 1, 128>}, {transform_indices = @transform_3, window_bounds = array<i64: 128, 128>}, {transform_indices = @transform_4, window_bounds = array<i64: 1, 128>}, {transform_indices = @transform_5, window_bounds = array<i64: 128, 128>}, {pipeline_mode = #tpu.pipeline_mode<synchronous>, transform_indices = @transform_6, window_bounds = array<i64: 1, 128>}, {transform_indices = @transform_7, window_bounds = array<i64: 256, 128>}]} {
    %c0_i32 = arith.constant 0 : i32
    %0 = arith.cmpi eq, %arg1, %c0_i32 : i32
    %1 = arith.extui %0 : i1 to i32
    %c0_i32_0 = arith.constant 0 : i32
    %2 = arith.cmpi ne, %1, %c0_i32_0 : i32
    scf.if %2 {
      %c0_18 = arith.constant 0 : index
      %c0_19 = arith.constant 0 : index
      %25 = vector.load %arg2[%c0_18, %c0_19] : memref<256x128xf32, #tpu.memory_space<vmem>>, vector<256x128xf32>
      %26 = tpu.iota {dimensions = array<i32: 1>} : vector<256x128xi32>
      %c32_i32 = arith.constant 32 : i32
      %27 = vector.broadcast %c32_i32 : i32 to vector<256x128xi32>
      %28 = arith.cmpi slt, %26, %27 : vector<256x128xi32>
      %cst_20 = arith.constant dense<0.000000e+00> : vector<256xf32>
      %29 = vector.multi_reduction <add>, %25, %cst_20 [1] : vector<256x128xf32> to vector<256xf32>
      %30 = vector.shape_cast %29 : vector<256xf32> to vector<256x1xf32>
      %cst_21 = arith.constant 3.125000e-02 : f32
      %31 = vector.broadcast %cst_21 : f32 to vector<256x1xf32>
      %32 = arith.mulf %30, %31 : vector<256x1xf32>
      %33 = vector.broadcast %32 : vector<256x1xf32> to vector<256x128xf32>
      %34 = arith.subf %25, %33 : vector<256x128xf32>
      %cst_22 = arith.constant 0.000000e+00 : f32
      %35 = vector.broadcast %cst_22 : f32 to vector<256x128xf32>
      %36 = arith.select %28, %34, %35 : vector<256x128xi1>, vector<256x128xf32>
      %37 = arith.mulf %36, %36 : vector<256x128xf32>
      %cst_23 = arith.constant dense<0.000000e+00> : vector<256xf32>
      %38 = vector.multi_reduction <add>, %37, %cst_23 [1] : vector<256x128xf32> to vector<256xf32>
      %39 = vector.shape_cast %38 : vector<256xf32> to vector<256x1xf32>
      %cst_24 = arith.constant 3.125000e-02 : f32
      %40 = vector.broadcast %cst_24 : f32 to vector<256x1xf32>
      %41 = arith.mulf %39, %40 : vector<256x1xf32>
      %cst_25 = arith.constant 9.99999974E-6 : f32
      %42 = vector.broadcast %cst_25 : f32 to vector<256x1xf32>
      %43 = arith.addf %41, %42 : vector<256x1xf32>
      %44 = math.rsqrt %43 : vector<256x1xf32>
      %45 = vector.broadcast %44 : vector<256x1xf32> to vector<256x128xf32>
      %46 = arith.mulf %36, %45 : vector<256x128xf32>
      %c0_26 = arith.constant 0 : index
      %c0_27 = arith.constant 0 : index
      %47 = vector.load %arg3[%c0_26, %c0_27] : memref<1x128xf32, #tpu.memory_space<vmem>>, vector<1x128xf32>
      %48 = vector.broadcast %47 : vector<1x128xf32> to vector<256x128xf32>
      %49 = arith.mulf %46, %48 : vector<256x128xf32>
      %c0_28 = arith.constant 0 : index
      %c0_29 = arith.constant 0 : index
      %50 = vector.load %arg4[%c0_28, %c0_29] : memref<1x128xf32, #tpu.memory_space<vmem>>, vector<1x128xf32>
      %51 = vector.broadcast %50 : vector<1x128xf32> to vector<256x128xf32>
      %52 = arith.addf %49, %51 : vector<256x128xf32>
      %c0_30 = arith.constant 0 : index
      %c0_31 = arith.constant 0 : index
      %53 = vector.load %arg10[%c0_30, %c0_31] : memref<256x128xf32, #tpu.memory_space<vmem>>, vector<256x128xf32>
      tpu.vector_store %arg10[%c0_30, %c0_31], %52 {strides = array<i32>} : memref<256x128xf32, #tpu.memory_space<vmem>>, vector<256x128xf32>,
      %cst_32 = arith.constant 0.000000e+00 : f32
      %54 = vector.broadcast %cst_32 : f32 to vector<256x128xf32>
      %c0_33 = arith.constant 0 : index
      %c0_34 = arith.constant 0 : index
      %55 = vector.load %arg11[%c0_33, %c0_34] : memref<256x128xf32, #tpu.memory_space<vmem>>, vector<256x128xf32>
      tpu.vector_store %arg11[%c0_33, %c0_34], %54 {strides = array<i32>} : memref<256x128xf32, #tpu.memory_space<vmem>>, vector<256x128xf32>,
    } else {
    }
    %c0 = arith.constant 0 : index
    %c0_1 = arith.constant 0 : index
    %3 = vector.load %arg10[%c0, %c0_1] : memref<256x128xf32, #tpu.memory_space<vmem>>, vector<256x128xf32>
    %c0_2 = arith.constant 0 : index
    %c0_3 = arith.constant 0 : index
    %4 = vector.load %arg5[%c0_2, %c0_3] : memref<128x128xf32, #tpu.memory_space<vmem>>, vector<128x128xf32>
    %cst = arith.constant dense<0.000000e+00> : vector<256x128xf32>
    %5 = tpu.matmul %3, %4, %cst {dimension_numbers = #tpu.dot_dimension_numbers<[1], [0], [0], [1], [0, 0, 1, 1], [], []>} : vector<256x128xf32>, vector<128x128xf32>, vector<256x128xf32> -> vector<256x128xf32>
    %c0_4 = arith.constant 0 : index
    %c0_5 = arith.constant 0 : index
    %6 = vector.load %arg6[%c0_4, %c0_5] : memref<1x128xf32, #tpu.memory_space<vmem>>, vector<1x128xf32>
    %7 = vector.broadcast %6 : vector<1x128xf32> to vector<256x128xf32>
    %8 = arith.addf %5, %7 : vector<256x128xf32>
    %cst_6 = arith.constant 5.000000e-01 : f32
    %9 = vector.broadcast %cst_6 : f32 to vector<256x128xf32>
    %10 = arith.mulf %9, %8 : vector<256x128xf32>
    %cst_7 = arith.constant 0.707106769 : f32
    %11 = vector.broadcast %cst_7 : f32 to vector<256x128xf32>
    %12 = arith.mulf %8, %11 : vector<256x128xf32>
    %13 = math.erf %12 : vector<256x128xf32>
    %cst_8 = arith.constant 1.000000e+00 : f32
    %14 = vector.broadcast %cst_8 : f32 to vector<256x128xf32>
    %15 = arith.addf %14, %13 : vector<256x128xf32>
    %16 = arith.mulf %10, %15 : vector<256x128xf32>
    %c0_9 = arith.constant 0 : index
    %c0_10 = arith.constant 0 : index
    %17 = vector.load %arg11[%c0_9, %c0_10] : memref<256x128xf32, #tpu.memory_space<vmem>>, vector<256x128xf32>
    %c0_11 = arith.constant 0 : index
    %c0_12 = arith.constant 0 : index
    %18 = vector.load %arg7[%c0_11, %c0_12] : memref<128x128xf32, #tpu.memory_space<vmem>>, vector<128x128xf32>
    %cst_13 = arith.constant dense<0.000000e+00> : vector<256x128xf32>
    %19 = tpu.matmul %16, %18, %cst_13 {dimension_numbers = #tpu.dot_dimension_numbers<[1], [0], [0], [1], [0, 0, 1, 1], [], []>} : vector<256x128xf32>, vector<128x128xf32>, vector<256x128xf32> -> vector<256x128xf32>
    %20 = arith.addf %17, %19 : vector<256x128xf32>
    %c0_14 = arith.constant 0 : index
    %c0_15 = arith.constant 0 : index
    %21 = vector.load %arg11[%c0_14, %c0_15] : memref<256x128xf32, #tpu.memory_space<vmem>>, vector<256x128xf32>
    tpu.vector_store %arg11[%c0_14, %c0_15], %20 {strides = array<i32>} : memref<256x128xf32, #tpu.memory_space<vmem>>, vector<256x128xf32>,
    %c0_i32_16 = arith.constant 0 : i32
    %22 = arith.cmpi eq, %arg1, %c0_i32_16 : i32
    %23 = arith.extui %22 : i1 to i32
    %c0_i32_17 = arith.constant 0 : i32
    %24 = arith.cmpi ne, %23, %c0_i32_17 : i32
    scf.if %24 {
      %c0_18 = arith.constant 0 : index
      %c0_19 = arith.constant 0 : index
      %25 = vector.load %arg11[%c0_18, %c0_19] : memref<256x128xf32, #tpu.memory_space<vmem>>, vector<256x128xf32>
      %c0_20 = arith.constant 0 : index
      %c0_21 = arith.constant 0 : index
      %26 = vector.load %arg8[%c0_20, %c0_21] : memref<1x128xf32, #tpu.memory_space<vmem>>, vector<1x128xf32>
      %27 = vector.broadcast %26 : vector<1x128xf32> to vector<256x128xf32>
      %28 = arith.addf %25, %27 : vector<256x128xf32>
      %c0_22 = arith.constant 0 : index
      %c0_23 = arith.constant 0 : index
      %29 = vector.load %arg2[%c0_22, %c0_23] : memref<256x128xf32, #tpu.memory_space<vmem>>, vector<256x128xf32>
      %30 = arith.addf %28, %29 : vector<256x128xf32>
      %c0_24 = arith.constant 0 : index
      %c0_25 = arith.constant 0 : index
      %31 = vector.load %arg9[%c0_24, %c0_25] : memref<256x128xf32, #tpu.memory_space<vmem>>, vector<256x128xf32>
      tpu.vector_store %arg9[%c0_24, %c0_25], %30 {strides = array<i32>} : memref<256x128xf32, #tpu.memory_space<vmem>>, vector<256x128xf32>,
    } else {
    }
    return
  }
  func.func @transform_0(%arg0: i32, %arg1: i32) -> (i32, i32) {
    %c0_i32 = arith.constant 0 : i32
    %c0_i32_0 = arith.constant 0 : i32
    return %arg0, %c0_i32 : i32, i32
  }
  func.func @transform_1(%arg0: i32, %arg1: i32) -> (i32, i32) {
    %c0_i32 = arith.constant 0 : i32
    %c0_i32_0 = arith.constant 0 : i32
    %c0_i32_1 = arith.constant 0 : i32
    return %c0_i32, %c0_i32_0 : i32, i32
  }
  func.func @transform_2(%arg0: i32, %arg1: i32) -> (i32, i32) {
    %c0_i32 = arith.constant 0 : i32
    %c0_i32_0 = arith.constant 0 : i32
    %c0_i32_1 = arith.constant 0 : i32
    return %c0_i32, %c0_i32_0 : i32, i32
  }
  func.func @transform_3(%arg0: i32, %arg1: i32) -> (i32, i32) {
    %c0_i32 = arith.constant 0 : i32
    %c0_i32_0 = arith.constant 0 : i32
    return %c0_i32, %arg1 : i32, i32
  }
  func.func @transform_4(%arg0: i32, %arg1: i32) -> (i32, i32) {
    %c0_i32 = arith.constant 0 : i32
    %c0_i32_0 = arith.constant 0 : i32
    return %c0_i32, %arg1 : i32, i32
  }
  func.func @transform_5(%arg0: i32, %arg1: i32) -> (i32, i32) {
    %c0_i32 = arith.constant 0 : i32
    %c0_i32_0 = arith.constant 0 : i32
    return %arg1, %c0_i32 : i32, i32
  }
  func.func @transform_6(%arg0: i32, %arg1: i32) -> (i32, i32) {
    %c0_i32 = arith.constant 0 : i32
    %c0_i32_0 = arith.constant 0 : i32
    %c0_i32_1 = arith.constant 0 : i32
    return %c0_i32, %c0_i32_0 : i32, i32
  }
  func.func @transform_7(%arg0: i32, %arg1: i32) -> (i32, i32) {
    %c0_i32 = arith.constant 0 : i32
    %c0_i32_0 = arith.constant 0 : i32
    return %arg0, %c0_i32 : i32, i32
  }
}

</mosaic_0001>

<bundles_post_ra>
// kernel: tpu_custom_call.1
= control target key start
LH: loop header
LB: loop body
LE: loop exit
PB: predicated region body
PF: predicated region fallthrough
CT: control target
= control target key end

     0   :  { %12 = vsyncpa [#allocation5], 0  ;;  %s3023_s0 = inlined_call_operand.hbm [shape: f32[256,128], index: 0, kind: input, shape index: {}]   ;;  %s3024_s1 = inlined_call_operand.hbm [shape: f32[1,128], index: 1, kind: input, shape index: {}]   ;;  %s3025_s2 = inlined_call_operand.hbm [shape: f32[1,128], index: 2, kind: input, shape index: {}]   ;;  %s3026_s3 = inlined_call_operand.hbm [shape: f32[128,128], index: 3, kind: input, shape index: {}]   ;;  %s3027_s4 = inlined_call_operand.hbm [shape: f32[1,128], index: 4, kind: input, shape index: {}]   ;;  %s3028_s5 = inlined_call_operand.hbm [shape: f32[128,128], index: 5, kind: input, shape index: {}]   ;;  %s3029_s6 = inlined_call_operand.hbm [shape: f32[1,128], index: 6, kind: input, shape index: {}]   ;;  %s3030_s7 = inlined_call_operand.hbm [shape: f32[256,128], index: 7, kind: output, shape index: {}]  }
   0x1   :  { %13 = vsyncpa [#allocation8], 0 }
   0x2   :  { %14 = vsyncpa [#allocation11], 0 }
   0x3   :  { %15 = vsyncpa [#allocation14], 0 }
   0x4   :  { %16 = vsyncpa [#allocation6], 0  ;;  %s2294_s24 = smov [#allocation7]   ;;  %s2108_s28 = scalar_lea.hbm %s3024_s1, 16 }
   0x5   :  { %s35_s25 = sshll.u32 %s2294_s24, 4  ;;  %p2109_p0 = scmp.ne.s32.totalorder %s3024_s1, %s2108_s28  ;;  %s36_s25 = int_to_ptr.vmem [resolvable:$true] %s35_s25 }
   0x6   :  { %p2112_p1 = scmp.lt.u32.totalorder %s2108_s28, %s3024_s1 }
   0x8   :  { %p2114_p2 = pnand %p2112_p1, %p2109_p0 }
   0xa   :  { %2117 = shalt.err (!%p2114_p2)
}
   0xb   :  { %s2118_s10 = scalar_lea.vmem %s36_s25, 16  ;;  %s2122_s11 = scalar_lea.vmem %s36_s25, 32 }
   0xc   :  { %p2119_p3 = scmp.ne.s32.totalorder %s36_s25, %s2118_s10  ;;  %p2123_p4 = scmp.lt.s32.totalorder %s36_s25, %s36_s25 }
   0xd   :  { %p2124_p5 = scmp.lt.s32.totalorder %s2122_s11, %s2118_s10 }
   0xf   :  { %p2125_p6 = por %p2124_p5, %p2123_p4 }
  0x11   :  { %p2126_p7 = pnand %p2125_p6, %p2119_p3 }
  0x13   :  { %2129 = shalt.err (!%p2126_p7)
}
  0x14   :  { %38 = dma.hbm_to_vmem [thread:$0]  %s3024_s1, 16, %s36_s25, [#allocation8]  }
  0x15   :  { %s2295_s14 = smov [#allocation10]   ;;  %s2296_s16 = smov [#allocation13]  }
  0x16   :  { %s54_s15 = sshll.u32 %s2295_s14, 4  ;;  %s76_s17 = sshll.u32 %s2296_s16, 4  ;;  %s55_s15 = int_to_ptr.vmem [resolvable:$true] %s54_s15  ;;  %s77_s17 = int_to_ptr.vmem [resolvable:$true] %s76_s17 }
  0x17   :  { %s2130_s20 = scalar_lea.hbm %s3026_s3, 2048 }
  0x18   :  { %p2131_p8 = scmp.ne.s32.totalorder %s3026_s3, %s2130_s20  ;;  %p2134_p9 = scmp.lt.u32.totalorder %s2130_s20, %s3026_s3 }
  0x1a   :  { %p2136_p10 = pnand %p2134_p9, %p2131_p8 }
  0x1c   :  { %2139 = shalt.err (!%p2136_p10)
}
  0x1d   :  { %s2140_s1 = scalar_lea.vmem %s55_s15, 2048  ;;  %p2145_p12 = scmp.lt.s32.totalorder %s55_s15, %s55_s15 }
  0x1e   :  { %p2141_p11 = scmp.ne.s32.totalorder %s55_s15, %s2140_s1  ;;  %p2146_p13 = scmp.lt.s32.totalorder %s2140_s1, %s2140_s1 }
  0x20   :  { %p2147_p0 = por %p2146_p13, %p2145_p12 }
  0x22   :  { %p2148_p1 = pnand %p2147_p0, %p2141_p11 }
  0x24   :  { %2151 = shalt.err (!%p2148_p1)
}
  0x25   :  { %s2297_s25 = smov 128   ;;  %s2298_s26 = smov 8  }
  0x26   :  { %60 = dma.hbm_to_vmem [thread:$0]  %s3026_s3, 2048, %s55_s15, [#allocation11], %s2297_s25, %s2297_s25, %s2298_s26  }
  0x27   :  { %s2152_s8 = scalar_lea.hbm %s3028_s5, 2048 }
  0x28   :  { %p2153_p2 = scmp.ne.s32.totalorder %s3028_s5, %s2152_s8  ;;  %p2156_p3 = scmp.lt.u32.totalorder %s2152_s8, %s3028_s5 }
  0x2a   :  { %p2158_p4 = pnand %p2156_p3, %p2153_p2 }
  0x2c   :  { %2161 = shalt.err (!%p2158_p4)
}
  0x2d   :  { %s2162_s13 = scalar_lea.vmem %s77_s17, 2048  ;;  %p2167_p6 = scmp.lt.s32.totalorder %s77_s17, %s77_s17 }
  0x2e   :  { %p2163_p5 = scmp.ne.s32.totalorder %s77_s17, %s2162_s13  ;;  %p2168_p7 = scmp.lt.s32.totalorder %s2162_s13, %s2162_s13 }
  0x30   :  { %p2169_p8 = por %p2168_p7, %p2167_p6 }
  0x32   :  { %p2170_p9 = pnand %p2169_p8, %p2163_p5 }
  0x34   :  { %2173 = shalt.err (!%p2170_p9)
}
  0x35   :  { %82 = dma.hbm_to_vmem [thread:$0]  %s3028_s5, 2048, %s77_s17, [#allocation14], %s2297_s25, %s2297_s25, %s2298_s26  }
  0x36   :  { %s2299_s15 = smov [#allocation4]   ;;  %s2300_s18 = smov [#allocation9]  }
  0x37   :  { %s22_s16 = sshll.u32 %s2299_s15, 4  ;;  %s45_s19 = sshll.u32 %s2300_s18, 4  ;;  %s23_s16 = int_to_ptr.vmem [resolvable:$true] %s22_s16  ;;  %s46_s19 = int_to_ptr.vmem [resolvable:$true] %s45_s19 }
  0x38   :  { %s2174_s22 = scalar_lea.hbm %s3023_s0, 4096 }
  0x39   :  { %p2175_p10 = scmp.ne.s32.totalorder %s3023_s0, %s2174_s22  ;;  %p2178_p11 = scmp.lt.u32.totalorder %s2174_s22, %s3023_s0 }
  0x3b   :  { %p2180_p12 = pnand %p2178_p11, %p2175_p10 }
  0x3d   :  { %2183 = shalt.err (!%p2180_p12)
}
  0x3e   :  { %s2184_s5 = scalar_lea.vmem %s23_s16, 4096  ;;  %p2189_p0 = scmp.lt.s32.totalorder %s23_s16, %s23_s16 }
  0x3f   :  { %p2185_p13 = scmp.ne.s32.totalorder %s23_s16, %s2184_s5  ;;  %p2190_p1 = scmp.lt.s32.totalorder %s2184_s5, %s2184_s5 }
  0x41   :  { %p2191_p2 = por %p2190_p1, %p2189_p0 }
  0x43   :  { %p2192_p3 = pnand %p2191_p2, %p2185_p13 }
  0x45   :  { %2195 = shalt.err (!%p2192_p3)
}
  0x46   :  { %28 = dma.hbm_to_vmem [thread:$0]  %s3023_s0, 4096, %s23_s16, [#allocation5], %s2297_s25, %s2297_s25, %s2298_s26  }
  0x47   :  { %s2196_s8 = scalar_lea.hbm %s3025_s2, 16 }
  0x48   :  { %p2197_p4 = scmp.ne.s32.totalorder %s3025_s2, %s2196_s8  ;;  %p2200_p5 = scmp.lt.u32.totalorder %s2196_s8, %s3025_s2 }
  0x4a   :  { %p2202_p6 = pnand %p2200_p5, %p2197_p4 }
  0x4c   :  { %2205 = shalt.err (!%p2202_p6)
}
  0x4d   :  { %s2206_s13 = scalar_lea.vmem %s46_s19, 16  ;;  %s2210_s3 = scalar_lea.vmem %s46_s19, 32 }
  0x4e   :  { %p2207_p7 = scmp.ne.s32.totalorder %s46_s19, %s2206_s13  ;;  %p2211_p8 = scmp.lt.s32.totalorder %s46_s19, %s46_s19 }
  0x4f   :  { %p2212_p9 = scmp.lt.s32.totalorder %s2210_s3, %s2206_s13 }
  0x51   :  { %p2213_p10 = por %p2212_p9, %p2211_p8 }
  0x53   :  { %p2214_p11 = pnand %p2213_p10, %p2207_p7 }
  0x55   :  { %2217 = shalt.err (!%p2214_p11)
}
  0x56   :  { %48 = dma.hbm_to_vmem [thread:$0]  %s3025_s2, 16, %s46_s19, [#allocation8]  }
  0x57   :  { %s2301_s15 = smov [#allocation12]   ;;  %s2302_s18 = smov [#allocation15]  }
  0x58   :  { %s67_s16 = sshll.u32 %s2301_s15, 4  ;;  %s89_s20 = sshll.u32 %s2302_s18, 4  ;;  %s68_s16 = int_to_ptr.vmem [resolvable:$true] %s67_s16  ;;  %s90_s20 = int_to_ptr.vmem [resolvable:$true] %s89_s20 }
  0x59   :  { %s2218_s23 = scalar_lea.hbm %s3027_s4, 16 }
  0x5a   :  { %p2219_p12 = scmp.ne.s32.totalorder %s3027_s4, %s2218_s23  ;;  %p2222_p13 = scmp.lt.u32.totalorder %s2218_s23, %s3027_s4 }
  0x5c   :  { %p2224_p0 = pnand %p2222_p13, %p2219_p12 }
  0x5e   :  { %2227 = shalt.err (!%p2224_p0)
}
  0x5f   :  { %s2228_s2 = scalar_lea.vmem %s68_s16, 16  ;;  %s2232_s19 = scalar_lea.vmem %s68_s16, 32 }
  0x60   :  { %p2229_p1 = scmp.ne.s32.totalorder %s68_s16, %s2228_s2  ;;  %p2233_p2 = scmp.lt.s32.totalorder %s68_s16, %s68_s16 }
  0x61   :  { %p2234_p3 = scmp.lt.s32.totalorder %s2232_s19, %s2228_s2 }
  0x63   :  { %p2235_p4 = por %p2234_p3, %p2233_p2 }
  0x65   :  { %p2236_p5 = pnand %p2235_p4, %p2229_p1 }
  0x67   :  { %2239 = shalt.err (!%p2236_p5)
}
  0x68   :  { %70 = dma.hbm_to_vmem [thread:$0]  %s3027_s4, 16, %s68_s16, [#allocation11]  }
  0x69   :  { %s2240_s8 = scalar_lea.hbm %s3029_s6, 16 }
  0x6a   :  { %p2241_p6 = scmp.ne.s32.totalorder %s3029_s6, %s2240_s8  ;;  %p2244_p7 = scmp.lt.u32.totalorder %s2240_s8, %s3029_s6 }
  0x6c   :  { %p2246_p8 = pnand %p2244_p7, %p2241_p6 }
  0x6e   :  { %2249 = shalt.err (!%p2246_p8)
}
  0x6f   :  { %s2250_s13 = scalar_lea.vmem %s90_s20, 16  ;;  %s2254_s3 = scalar_lea.vmem %s90_s20, 32 }
  0x70   :  { %p2251_p9 = scmp.ne.s32.totalorder %s90_s20, %s2250_s13  ;;  %p2255_p10 = scmp.lt.s32.totalorder %s90_s20, %s90_s20 }
  0x71   :  { %p2256_p11 = scmp.lt.s32.totalorder %s2254_s3, %s2250_s13 }
  0x73   :  { %p2257_p12 = por %p2256_p11, %p2255_p10 }
  0x75   :  { %p2258_p13 = pnand %p2257_p12, %p2251_p9 }
  0x77   :  { %2261 = shalt.err (!%p2258_p13)
}
  0x78   :  { %92 = dma.hbm_to_vmem [thread:$0]  %s3029_s6, 16, %s90_s20, [#allocation14]  }
  0x79   :  { %2284 = dma.done.wait [#allocation5], 4096  }
  0x7a   :  { %2285 = vsyncadd [#allocation5], 4294963200 }
  0x7b   :  { %2286 = dma.done.wait [#allocation8], 32  }
  0x7c   :  { %2287 = vsyncadd [#allocation8], 4294967264 }
  0x7d   :  { %2288 = dma.done.wait [#allocation11], 2064  }
  0x7e   :  { %2289 = vsyncadd [#allocation11], 4294965232 }
  0x7f   :  { %2290 = dma.done.wait [#allocation14], 2064  }
  0x80   :  { %2291 = vsyncadd [#allocation14], 4294965232  ;;  %v2437_v0 = vld [vmem:[#allocation4] sm:$0xff]  ;;  %v2439_v1 = vld [vmem:[#allocation4 + $0x10] sm:$0xff]  ;;  %v150_v38 = vlaneseq  ;;  %s2303_s6 = smov [#allocation16]  }
  0x81   :  { %153 = vadd.xlane.f32.xlu0 %v2437_v0  ;;  %157 = vadd.xlane.f32.xlu1 %v2439_v1  ;;  %v2443_v2 = vld [vmem:[#allocation4 + $0x8] sm:$0xff]  ;;  %v2445_v3 = vld [vmem:[#allocation4 + $0x18] sm:$0xff]  ;;  %v2449_v4 = vld [vmem:[#allocation4 + $0x20] sm:$0xff]  ;;  %s1631_s14 = sshll.u32 %s2303_s6, 4  ;;  %s1632_s14 = int_to_ptr.vmem [resolvable:$true] %s1631_s14 }
  0x82   :  { %v2451_v5 = vld [vmem:[#allocation4 + $0x28] sm:$0xff]  ;;  %v2455_v6 = vld [vmem:[#allocation4 + $0x30] sm:$0xff]  ;;  %v2457_v7 = vld [vmem:[#allocation4 + $0x38] sm:$0xff]  ;;  %v2533_v39 = vand.u32 127, %v150_v38  ;;  %s2262_s15 = scalar_lea.vmem %s1632_s14, 4096  ;;  %p2267_p1 = scmp.lt.s32.totalorder %s1632_s14, %s1632_s14 }
  0x83   :  { %v2461_v8 = vld [vmem:[#allocation4 + $0x40] sm:$0xff]  ;;  %v2463_v9 = vld [vmem:[#allocation4 + $0x48] sm:$0xff]  ;;  %v2467_v10 = vld [vmem:[#allocation4 + $0x50] sm:$0xff]  ;;  %p2263_p0 = scmp.ne.s32.totalorder %s1632_s14, %s2262_s15  ;;  %p2268_p2 = scmp.lt.s32.totalorder %s2262_s15, %s2262_s15 }
  0x84   :  { %v2469_v11 = vld [vmem:[#allocation4 + $0x58] sm:$0xff]  ;;  %v2473_v12 = vld [vmem:[#allocation4 + $0x60] sm:$0xff]  ;;  %v2475_v13 = vld [vmem:[#allocation4 + $0x68] sm:$0xff]  ;;  %vm152_vm0 = vcmp.lt.s32.totalorder %v2533_v39, 32 }
  0x85   :  { %155 = vadd.xlane.f32.xlu0 %v2443_v2  ;;  %159 = vadd.xlane.f32.xlu1 %v2445_v3  ;;  %v2479_v14 = vld [vmem:[#allocation4 + $0x70] sm:$0xff]  ;;  %v2481_v15 = vld [vmem:[#allocation4 + $0x78] sm:$0xff]  ;;  %v2485_v16 = vld [vmem:[#allocation4 + $0x80] sm:$0xff]  ;;  %p2269_p3 = por %p2268_p2, %p2267_p1 }
  0x86   :  { %v2487_v17 = vld [vmem:[#allocation4 + $0x88] sm:$0xff]  ;;  %v2491_v18 = vld [vmem:[#allocation4 + $0x90] sm:$0xff]  ;;  %v2493_v19 = vld [vmem:[#allocation4 + $0x98] sm:$0xff] }
  0x87   :  { %v2497_v20 = vld [vmem:[#allocation4 + $0xa0] sm:$0xff]  ;;  %v2499_v21 = vld [vmem:[#allocation4 + $0xa8] sm:$0xff]  ;;  %v2503_v22 = vld [vmem:[#allocation4 + $0xb0] sm:$0xff]  ;;  %p2270_p4 = pnand %p2269_p3, %p2263_p0 }
  0x88   :  { %v2505_v23 = vld [vmem:[#allocation4 + $0xb8] sm:$0xff]  ;;  %v2509_v24 = vld [vmem:[#allocation4 + $0xc0] sm:$0xff]  ;;  %v2511_v25 = vld [vmem:[#allocation4 + $0xc8] sm:$0xff] }
  0x89   :  { %161 = vadd.xlane.f32.xlu0 %v2449_v4  ;;  %163 = vadd.xlane.f32.xlu1 %v2451_v5  ;;  %v2515_v26 = vld [vmem:[#allocation4 + $0xd0] sm:$0xff]  ;;  %v2517_v27 = vld [vmem:[#allocation4 + $0xd8] sm:$0xff]  ;;  %v2521_v28 = vld [vmem:[#allocation4 + $0xe0] sm:$0xff] }
  0x8a   :  { %v2523_v29 = vld [vmem:[#allocation4 + $0xe8] sm:$0xff]  ;;  %v2527_v30 = vld [vmem:[#allocation4 + $0xf0] sm:$0xff]  ;;  %v2529_v31 = vld [vmem:[#allocation4 + $0xf8] sm:$0xff] }
  0x8b   :  { %v711_v32 = vld [vmem:[#allocation10] sm:$0xff]  ;;  %v712_v33 = vld [vmem:[#allocation10 + $0x8] sm:$0xff]  ;;  %v713_v34 = vld [vmem:[#allocation10 + $0x10] sm:$0xff] }
  0x8c   :  { %v1906_v35 = vpack.c.bf16 %v712_v33, %v711_v32  ;;  %v714_v36 = vld [vmem:[#allocation10 + $0x18] sm:$0xff] }
  0x8d   :  { %165 = vadd.xlane.f32.xlu0 %v2455_v6  ;;  %167 = vadd.xlane.f32.xlu1 %v2457_v7  ;;  %v1910_v37 = vpack.c.bf16 %v714_v36, %v713_v34 }
  0x8e   :  { %1907 = vmatprep.subr.bf16.mxu0 %v1906_v35 }
  0x8f   :  { %1909 = vmatpush3.bf16.msra.mxu0 %v1906_v35 }
  0x90   :  { %1911 = vmatprep.subr.bf16.mxu0 %v1910_v37 }
  0x91   :  { %169 = vadd.xlane.f32.xlu0 %v2461_v8  ;;  %171 = vadd.xlane.f32.xlu1 %v2463_v9 }
  0x93   :  { %1913 = vmatpush3.bf16.msra.mxu0 %v1910_v37 }
  0x95   :  { %173 = vadd.xlane.f32.xlu0 %v2467_v10  ;;  %175 = vadd.xlane.f32.xlu1 %v2469_v11 }
  0x99   :  { %177 = vadd.xlane.f32.xlu0 %v2473_v12  ;;  %179 = vadd.xlane.f32.xlu1 %v2475_v13 }
  0x9d   :  { %181 = vadd.xlane.f32.xlu0 %v2479_v14  ;;  %183 = vadd.xlane.f32.xlu1 %v2481_v15 }
  0xa1   :  { %185 = vadd.xlane.f32.xlu0 %v2485_v16  ;;  %187 = vadd.xlane.f32.xlu1 %v2487_v17 }
  0xa5   :  { %189 = vadd.xlane.f32.xlu0 %v2491_v18  ;;  %191 = vadd.xlane.f32.xlu1 %v2493_v19 }
  0xa9   :  { %193 = vadd.xlane.f32.xlu0 %v2497_v20  ;;  %195 = vadd.xlane.f32.xlu1 %v2499_v21 }
  0xad   :  { %197 = vadd.xlane.f32.xlu0 %v2503_v22  ;;  %199 = vadd.xlane.f32.xlu1 %v2505_v23 }
  0xb1   :  { %201 = vadd.xlane.f32.xlu0 %v2509_v24  ;;  %203 = vadd.xlane.f32.xlu1 %v2511_v25 }
  0xb5   :  { %205 = vadd.xlane.f32.xlu0 %v2515_v26  ;;  %207 = vadd.xlane.f32.xlu1 %v2517_v27 }
  0xb9   :  { %209 = vadd.xlane.f32.xlu0 %v2521_v28  ;;  %211 = vadd.xlane.f32.xlu1 %v2523_v29 }
  0xbd   :  { %213 = vadd.xlane.f32.xlu0 %v2527_v30  ;;  %215 = vadd.xlane.f32.xlu1 %v2529_v31 }
 0x10e   :  { %v154_v40 = vpop.xlane.xlu0 %153  ;;  %v158_v41 = vpop.xlane.xlu1 %157 }
 0x10f   :  { %v217_v42 = vmul.f32 0.03125, %v154_v40  ;;  %v219_v43 = vmul.f32 0.03125, %v158_v41 }
 0x111   :  { %v249_v44 = vsub.f32 %v2437_v0, %v217_v42  ;;  %v251_v45 = vsub.f32 %v2439_v1, %v219_v43 }
 0x112   :  { %v156_v46 = vpop.xlane.xlu0 %155  ;;  %v160_v47 = vpop.xlane.xlu1 %159 }
 0x113   :  { %v218_v48 = vmul.f32 0.03125, %v156_v46  ;;  %v220_v49 = vmul.f32 0.03125, %v160_v47  ;;  %v2540_v50 = vsel %vm152_vm0, %v249_v44, 0.0  ;;  %v2544_v51 = vsel %vm152_vm0, %v251_v45, 0.0 }
 0x114   :  { %v313_v52 = vmul.f32 %v2540_v50, %v2540_v50  ;;  %v315_v57 = vmul.f32 %v2544_v51, %v2544_v51 }
 0x115   :  { %v250_v53 = vsub.f32 %v2443_v2, %v218_v48  ;;  %v252_v54 = vsub.f32 %v2445_v3, %v220_v49  ;;  %v715_v49 = vld [vmem:[#allocation10 + $0x20] sm:$0xff] }
 0x116   :  { %345 = vadd.xlane.f32.xlu0 %v313_v52  ;;  %v162_v55 = vpop.xlane.xlu0 %161  ;;  %v164_v56 = vpop.xlane.xlu1 %163  ;;  %v716_v52 = vld [vmem:[#allocation10 + $0x28] sm:$0xff] }
 0x117   :  { %v221_v58 = vmul.f32 0.03125, %v162_v55  ;;  %v222_v59 = vmul.f32 0.03125, %v164_v56  ;;  %v2554_v60 = vsel %vm152_vm0, %v250_v53, 0.0  ;;  %v2558_v61 = vsel %vm152_vm0, %v252_v54, 0.0 }
 0x118   :  { %v314_v62 = vmul.f32 %v2554_v60, %v2554_v60  ;;  %v316_v3 = vmul.f32 %v2558_v61, %v2558_v61  ;;  %v1914_v56 = vpack.c.bf16 %v716_v52, %v715_v49 }
 0x119   :  { %v253_v63 = vsub.f32 %v2449_v4, %v221_v58  ;;  %v254_v0 = vsub.f32 %v2451_v5, %v222_v59 }
 0x11a   :  { %349 = vadd.xlane.f32.xlu0 %v315_v57  ;;  %347 = vadd.xlane.f32.xlu1 %v314_v62  ;;  %v166_v1 = vpop.xlane.xlu0 %165  ;;  %v168_v2 = vpop.xlane.xlu1 %167 }
 0x11b   :  { %v223_v32 = vmul.f32 0.03125, %v166_v1  ;;  %v224_v33 = vmul.f32 0.03125, %v168_v2  ;;  %v2568_v34 = vsel %vm152_vm0, %v253_v63, 0.0  ;;  %v2572_v35 = vsel %vm152_vm0, %v254_v0, 0.0  ;;  %1915 = vmatprep.subr.bf16.mxu0 %v1914_v56 }
 0x11c   :  { %v317_v4 = vmul.f32 %v2568_v34, %v2568_v34  ;;  %v318_v40 = vmul.f32 %v2572_v35, %v2572_v35  ;;  %1917 = vmatpush3.bf16.msra.mxu0 %v1914_v56 }
 0x11d   :  { %v255_v5 = vsub.f32 %v2455_v6, %v223_v32  ;;  %v256_v36 = vsub.f32 %v2457_v7, %v224_v33 }
 0x11e   :  { %351 = vadd.xlane.f32.xlu1 %v316_v3  ;;  %353 = vadd.xlane.f32.xlu0 %v317_v4  ;;  %v170_v37 = vpop.xlane.xlu0 %169  ;;  %v172_v38 = vpop.xlane.xlu1 %171 }
 0x11f   :  { %v225_v41 = vmul.f32 0.03125, %v170_v37  ;;  %v226_v42 = vmul.f32 0.03125, %v172_v38  ;;  %v2582_v43 = vsel %vm152_vm0, %v255_v5, 0.0  ;;  %v2586_v44 = vsel %vm152_vm0, %v256_v36, 0.0 }
 0x120   :  { %v319_v6 = vmul.f32 %v2582_v43, %v2582_v43  ;;  %v320_v48 = vmul.f32 %v2586_v44, %v2586_v44 }
 0x121   :  { %v257_v7 = vsub.f32 %v2461_v8, %v225_v41  ;;  %v258_v45 = vsub.f32 %v2463_v9, %v226_v42 }
 0x122   :  { %355 = vadd.xlane.f32.xlu1 %v318_v40  ;;  %357 = vadd.xlane.f32.xlu0 %v319_v6  ;;  %v174_v46 = vpop.xlane.xlu0 %173  ;;  %v176_v47 = vpop.xlane.xlu1 %175 }
 0x123   :  { %v227_v53 = vmul.f32 0.03125, %v174_v46  ;;  %v228_v54 = vmul.f32 0.03125, %v176_v47  ;;  %v2596_v55 = vsel %vm152_vm0, %v257_v7, 0.0  ;;  %v2600_v8 = vsel %vm152_vm0, %v258_v45, 0.0 }
 0x124   :  { %v321_v9 = vmul.f32 %v2596_v55, %v2596_v55  ;;  %v322_v63 = vmul.f32 %v2600_v8, %v2600_v8 }
 0x125   :  { %v259_v57 = vsub.f32 %v2467_v10, %v227_v53  ;;  %v260_v58 = vsub.f32 %v2469_v11, %v228_v54  ;;  %v717_v10 = vld [vmem:[#allocation10 + $0x30] sm:$0xff]  ;;  %v718_v11 = vld [vmem:[#allocation10 + $0x38] sm:$0xff] }
 0x126   :  { %359 = vadd.xlane.f32.xlu1 %v320_v48  ;;  %361 = vadd.xlane.f32.xlu0 %v321_v9  ;;  %v178_v59 = vpop.xlane.xlu0 %177  ;;  %v180_v62 = vpop.xlane.xlu1 %179  ;;  %v1918_v33 = vpack.c.bf16 %v718_v11, %v717_v10 }
 0x127   :  { %v229_v0 = vmul.f32 0.03125, %v178_v59  ;;  %v230_v1 = vmul.f32 0.03125, %v180_v62  ;;  %v2610_v2 = vsel %vm152_vm0, %v259_v57, 0.0  ;;  %v2614_v3 = vsel %vm152_vm0, %v260_v58, 0.0 }
 0x128   :  { %v323_v32 = vmul.f32 %v2610_v2, %v2610_v2  ;;  %v324_v38 = vmul.f32 %v2614_v3, %v2614_v3  ;;  %1919 = vmatprep.subr.bf16.mxu0 %v1918_v33 }
 0x129   :  { %v261_v4 = vsub.f32 %v2473_v12, %v229_v0  ;;  %v262_v5 = vsub.f32 %v2475_v13, %v230_v1  ;;  %v719_v12 = vld [vmem:[#allocation10 + $0x40] sm:$0xff]  ;;  %v720_v13 = vld [vmem:[#allocation10 + $0x48] sm:$0xff]  ;;  %1921 = vmatpush3.bf16.msra.mxu0 %v1918_v33 }
 0x12a   :  { %363 = vadd.xlane.f32.xlu1 %v322_v63  ;;  %365 = vadd.xlane.f32.xlu0 %v323_v32  ;;  %v182_v36 = vpop.xlane.xlu0 %181  ;;  %v184_v37 = vpop.xlane.xlu1 %183  ;;  %v1922_v45 = vpack.c.bf16 %v720_v13, %v719_v12 }
 0x12b   :  { %v231_v40 = vmul.f32 0.03125, %v182_v36  ;;  %v232_v41 = vmul.f32 0.03125, %v184_v37  ;;  %v2624_v42 = vsel %vm152_vm0, %v261_v4, 0.0  ;;  %v2628_v6 = vsel %vm152_vm0, %v262_v5, 0.0 }
 0x12c   :  { %v325_v7 = vmul.f32 %v2624_v42, %v2624_v42  ;;  %v326_v52 = vmul.f32 %v2628_v6, %v2628_v6  ;;  %1923 = vmatprep.subr.bf16.mxu0 %v1922_v45 }
 0x12d   :  { %v263_v46 = vsub.f32 %v2479_v14, %v231_v40  ;;  %v264_v47 = vsub.f32 %v2481_v15, %v232_v41  ;;  %v721_v14 = vld [vmem:[#allocation10 + $0x50] sm:$0xff]  ;;  %v722_v15 = vld [vmem:[#allocation10 + $0x58] sm:$0xff]  ;;  %1925 = vmatpush3.bf16.msra.mxu0 %v1922_v45 }
 0x12e   :  { %367 = vadd.xlane.f32.xlu1 %v324_v38  ;;  %369 = vadd.xlane.f32.xlu0 %v325_v7  ;;  %v186_v48 = vpop.xlane.xlu0 %185  ;;  %v188_v49 = vpop.xlane.xlu1 %187  ;;  %v1926_v58 = vpack.c.bf16 %v722_v15, %v721_v14 }
 0x12f   :  { %v233_v53 = vmul.f32 0.03125, %v186_v48  ;;  %v234_v54 = vmul.f32 0.03125, %v188_v49  ;;  %v2638_v9 = vsel %vm152_vm0, %v263_v46, 0.0  ;;  %v2642_v56 = vsel %vm152_vm0, %v264_v47, 0.0 }
 0x130   :  { %v327_v57 = vmul.f32 %v2638_v9, %v2638_v9  ;;  %v328_v1 = vmul.f32 %v2642_v56, %v2642_v56  ;;  %1927 = vmatprep.subr.bf16.mxu0 %v1926_v58 }
 0x131   :  { %v265_v59 = vsub.f32 %v2485_v16, %v233_v53  ;;  %v266_v62 = vsub.f32 %v2487_v17, %v234_v54  ;;  %v723_v16 = vld [vmem:[#allocation10 + $0x60] sm:$0xff]  ;;  %v724_v17 = vld [vmem:[#allocation10 + $0x68] sm:$0xff]  ;;  %1929 = vmatpush3.bf16.msra.mxu0 %v1926_v58 }
 0x132   :  { %371 = vadd.xlane.f32.xlu1 %v326_v52  ;;  %373 = vadd.xlane.f32.xlu0 %v327_v57  ;;  %v190_v63 = vpop.xlane.xlu0 %189  ;;  %v192_v0 = vpop.xlane.xlu1 %191  ;;  %v1930_v5 = vpack.c.bf16 %v724_v17, %v723_v16 }
 0x133   :  { %v235_v10 = vmul.f32 0.03125, %v190_v63  ;;  %v236_v11 = vmul.f32 0.03125, %v192_v0  ;;  %v2652_v32 = vsel %vm152_vm0, %v265_v59, 0.0  ;;  %v2656_v33 = vsel %vm152_vm0, %v266_v62, 0.0 }
 0x134   :  { %v329_v4 = vmul.f32 %v2652_v32, %v2652_v32  ;;  %v330_v41 = vmul.f32 %v2656_v33, %v2656_v33  ;;  %1931 = vmatprep.subr.bf16.mxu0 %v1930_v5 }
 0x135   :  { %v267_v36 = vsub.f32 %v2491_v18, %v235_v10  ;;  %v268_v37 = vsub.f32 %v2493_v19, %v236_v11  ;;  %v725_v18 = vld [vmem:[#allocation10 + $0x70] sm:$0xff]  ;;  %v726_v19 = vld [vmem:[#allocation10 + $0x78] sm:$0xff]  ;;  %1933 = vmatpush3.bf16.msra.mxu0 %v1930_v5 }
 0x136   :  { %375 = vadd.xlane.f32.xlu1 %v328_v1  ;;  %377 = vadd.xlane.f32.xlu0 %v329_v4  ;;  %v194_v38 = vpop.xlane.xlu0 %193  ;;  %v196_v40 = vpop.xlane.xlu1 %195  ;;  %v1934_v47 = vpack.c.bf16 %v726_v19, %v725_v18 }
 0x137   :  { %v237_v12 = vmul.f32 0.03125, %v194_v38  ;;  %v238_v13 = vmul.f32 0.03125, %v196_v40  ;;  %v2666_v7 = vsel %vm152_vm0, %v267_v36, 0.0  ;;  %v2670_v45 = vsel %vm152_vm0, %v268_v37, 0.0 }
 0x138   :  { %v331_v46 = vmul.f32 %v2666_v7, %v2666_v7  ;;  %v332_v54 = vmul.f32 %v2670_v45, %v2670_v45  ;;  %1935 = vmatprep.subr.bf16.mxu0 %v1934_v47 }
 0x139   :  { %v269_v48 = vsub.f32 %v2497_v20, %v237_v12  ;;  %v270_v49 = vsub.f32 %v2499_v21, %v238_v13  ;;  %1937 = vmatpush3.bf16.msra.mxu0 %v1934_v47 }
 0x13a   :  { %379 = vadd.xlane.f32.xlu1 %v330_v41  ;;  %381 = vadd.xlane.f32.xlu0 %v331_v46  ;;  %v198_v52 = vpop.xlane.xlu0 %197  ;;  %v200_v53 = vpop.xlane.xlu1 %199 }
 0x13b   :  { %v239_v14 = vmul.f32 0.03125, %v198_v52  ;;  %v240_v15 = vmul.f32 0.03125, %v200_v53  ;;  %v2680_v57 = vsel %vm152_vm0, %v269_v48, 0.0  ;;  %v2684_v58 = vsel %vm152_vm0, %v270_v49, 0.0 }
 0x13c   :  { %v333_v20 = vmul.f32 %v2680_v57, %v2680_v57  ;;  %v334_v0 = vmul.f32 %v2684_v58, %v2684_v58 }
 0x13d   :  { %v271_v21 = vsub.f32 %v2503_v22, %v239_v14  ;;  %v272_v59 = vsub.f32 %v2505_v23, %v240_v15 }
 0x13e   :  { %383 = vadd.xlane.f32.xlu1 %v332_v54  ;;  %385 = vadd.xlane.f32.xlu0 %v333_v20  ;;  %v202_v62 = vpop.xlane.xlu0 %201  ;;  %v204_v63 = vpop.xlane.xlu1 %203 }
 0x13f   :  { %v241_v1 = vmul.f32 0.03125, %v202_v62  ;;  %v242_v10 = vmul.f32 0.03125, %v204_v63  ;;  %v2694_v11 = vsel %vm152_vm0, %v271_v21, 0.0  ;;  %v2698_v16 = vsel %vm152_vm0, %v272_v59, 0.0 }
 0x140   :  { %v335_v22 = vmul.f32 %v2694_v11, %v2694_v11  ;;  %v336_v36 = vmul.f32 %v2698_v16, %v2698_v16 }
 0x141   :  { %v273_v23 = vsub.f32 %v2509_v24, %v241_v1  ;;  %v274_v17 = vsub.f32 %v2511_v25, %v242_v10 }
 0x142   :  { %387 = vadd.xlane.f32.xlu1 %v334_v0  ;;  %389 = vadd.xlane.f32.xlu0 %v335_v22  ;;  %v206_v4 = vpop.xlane.xlu0 %205  ;;  %v208_v5 = vpop.xlane.xlu1 %207  ;;  %v1152_v22 = vld [vmem:[#allocation13 + $0x8] sm:$0xff] }
 0x143   :  { %v243_v37 = vmul.f32 0.03125, %v206_v4  ;;  %v244_v38 = vmul.f32 0.03125, %v208_v5  ;;  %v2708_v40 = vsel %vm152_vm0, %v273_v23, 0.0  ;;  %v2712_v41 = vsel %vm152_vm0, %v274_v17, 0.0  ;;  %v1153_v23 = vld [vmem:[#allocation13 + $0x10] sm:$0xff]  ;;  %v1154_v4 = vld [vmem:[#allocation13 + $0x18] sm:$0xff] }
 0x144   :  { %v337_v24 = vmul.f32 %v2708_v40, %v2708_v40  ;;  %v338_v19 = vmul.f32 %v2712_v41, %v2712_v41  ;;  %v1942_v5 = vpack.c.bf16 %v1154_v4, %v1153_v23 }
 0x145   :  { %v275_v25 = vsub.f32 %v2515_v26, %v243_v37  ;;  %v276_v12 = vsub.f32 %v2517_v27, %v244_v38  ;;  %v1156_v37 = vld [vmem:[#allocation13 + $0x28] sm:$0xff] }
 0x146   :  { %391 = vadd.xlane.f32.xlu1 %v336_v36  ;;  %393 = vadd.xlane.f32.xlu0 %v337_v24  ;;  %v210_v13 = vpop.xlane.xlu0 %209  ;;  %v212_v18 = vpop.xlane.xlu1 %211  ;;  %v1155_v36 = vld [vmem:[#allocation13 + $0x20] sm:$0xff] }
 0x147   :  { %v245_v46 = vmul.f32 0.03125, %v210_v13  ;;  %v246_v47 = vmul.f32 0.03125, %v212_v18  ;;  %v2722_v48 = vsel %vm152_vm0, %v275_v25, 0.0  ;;  %v2726_v49 = vsel %vm152_vm0, %v276_v12, 0.0 }
 0x148   :  { %v339_v26 = vmul.f32 %v2722_v48, %v2722_v48  ;;  %v340_v14 = vmul.f32 %v2726_v49, %v2726_v49  ;;  %v1946_v39 = vpack.c.bf16 %v1156_v37, %v1155_v36 }
 0x149   :  { %v277_v27 = vsub.f32 %v2521_v28, %v245_v46  ;;  %v278_v52 = vsub.f32 %v2523_v29, %v246_v47 }
 0x14a   :  { %395 = vadd.xlane.f32.xlu1 %v338_v19  ;;  %397 = vadd.xlane.f32.xlu0 %v339_v26  ;;  %v214_v53 = vpop.xlane.xlu0 %213  ;;  %v216_v54 = vpop.xlane.xlu1 %215 }
 0x14b   :  { %v247_v15 = vmul.f32 0.03125, %v214_v53  ;;  %v248_v20 = vmul.f32 0.03125, %v216_v54  ;;  %v2736_v21 = vsel %vm152_vm0, %v277_v27, 0.0  ;;  %v2740_v59 = vsel %vm152_vm0, %v278_v52, 0.0 }
 0x14c   :  { %v341_v28 = vmul.f32 %v2736_v21, %v2736_v21  ;;  %v342_v63 = vmul.f32 %v2740_v59, %v2740_v59 }
 0x14d   :  { %v279_v29 = vsub.f32 %v2527_v30, %v247_v15  ;;  %v280_v62 = vsub.f32 %v2529_v31, %v248_v20  ;;  %v1151_v31 = vld [vmem:[#allocation13] sm:$0xff] }
 0x14e   :  { %399 = vadd.xlane.f32.xlu1 %v340_v14  ;;  %401 = vadd.xlane.f32.xlu0 %v341_v28  ;;  %v1938_v17 = vpack.c.bf16 %v1152_v22, %v1151_v31 }
 0x14f   :  { %v2750_v0 = vsel %vm152_vm0, %v279_v29, 0.0  ;;  %v2754_v1 = vsel %vm152_vm0, %v280_v62, 0.0 }
 0x150   :  { %v343_v10 = vmul.f32 %v2750_v0, %v2750_v0  ;;  %v344_v30 = vmul.f32 %v2754_v1, %v2754_v1  ;;  %1939 = vmatprep.subr.bf16.mxu1 %v1938_v17 }
 0x151   :  { %1941 = vmatpush3.bf16.msra.mxu1 %v1938_v17 }
 0x152   :  { %403 = vadd.xlane.f32.xlu1 %v342_v63  ;;  %405 = vadd.xlane.f32.xlu0 %v343_v10 }
 0x153   :  { %1943 = vmatprep.subr.bf16.mxu1 %v1942_v5 }
 0x155   :  { %1945 = vmatpush3.bf16.msra.mxu1 %v1942_v5  ;;  %v2763_v5 = vld [vmem:[#allocation9] ss:$0 sm:$0xff] }
 0x156   :  { %407 = vadd.xlane.f32.xlu1 %v344_v30  ;;  %1947 = vmatprep.subr.bf16.mxu1 %v1946_v39  ;;  %v2760_v30 = vld [vmem:[#allocation7] ss:$0 sm:$0xff] }
 0x159   :  { %1949 = vmatpush3.bf16.msra.mxu1 %v1946_v39 }
 0x1a3   :  { %v346_v38 = vpop.xlane.xlu0 %345 }
 0x1a4   :  { %v409_v24 = vmul.f32 0.03125, %v346_v38 }
 0x1a6   :  { %v441_v25 = vadd.f32 1e-05, %v409_v24 }
 0x1a7   :  { %v348_v12 = vpop.xlane.xlu1 %347  ;;  %v350_v13 = vpop.xlane.xlu0 %349 }
 0x1a8   :  { %1980 = vrsqrt.f32 %v441_v25  ;;  %v410_v18 = vmul.f32 0.03125, %v348_v12  ;;  %v411_v19 = vmul.f32 0.03125, %v350_v13 }
 0x1aa   :  { %v442_v46 = vadd.f32 1e-05, %v410_v18  ;;  %v443_v47 = vadd.f32 1e-05, %v411_v19 }
 0x1ab   :  { %v352_v26 = vpop.xlane.xlu1 %351  ;;  %v354_v27 = vpop.xlane.xlu0 %353 }
 0x1ac   :  { %1982 = vrsqrt.f32 %v442_v46  ;;  %v412_v52 = vmul.f32 0.03125, %v352_v26  ;;  %v413_v53 = vmul.f32 0.03125, %v354_v27 }
 0x1ad   :  { %1984 = vrsqrt.f32 %v443_v47 }
 0x1ae   :  { %v444_v54 = vadd.f32 1e-05, %v412_v52  ;;  %v445_v14 = vadd.f32 1e-05, %v413_v53 }
 0x1af   :  { %v356_v15 = vpop.xlane.xlu1 %355  ;;  %v358_v20 = vpop.xlane.xlu0 %357 }
 0x1b0   :  { %1986 = vrsqrt.f32 %v444_v54  ;;  %v414_v28 = vmul.f32 0.03125, %v356_v15  ;;  %v415_v29 = vmul.f32 0.03125, %v358_v20 }
 0x1b1   :  { %1988 = vrsqrt.f32 %v445_v14 }
 0x1b2   :  { %v1981_v62 = vpop.eup %1980  ;;  %v446_v63 = vadd.f32 1e-05, %v414_v28  ;;  %v447_v10 = vadd.f32 1e-05, %v415_v29 }
 0x1b3   :  { %v360_v31 = vpop.xlane.xlu1 %359  ;;  %v362_v22 = vpop.xlane.xlu0 %361  ;;  %v505_v23 = vmul.f32 %v1981_v62, %v2540_v50 }
 0x1b4   :  { %1990 = vrsqrt.f32 %v446_v63  ;;  %v416_v17 = vmul.f32 0.03125, %v360_v31  ;;  %v417_v4 = vmul.f32 0.03125, %v362_v22 }
 0x1b5   :  { %1992 = vrsqrt.f32 %v447_v10  ;;  %v544_v36 = vmul.f32 %v2760_v30, %v505_v23 }
 0x1b6   :  { %v1983_v37 = vpop.eup %1982  ;;  %v448_v39 = vadd.f32 1e-05, %v416_v17  ;;  %v449_v38 = vadd.f32 1e-05, %v417_v4 }
 0x1b7   :  { %v1985_v24 = vpop.eup %1984  ;;  %v364_v25 = vpop.xlane.xlu1 %363  ;;  %v583_v13 = vadd.f32 %v2763_v5, %v544_v36  ;;  %v506_v18 = vmul.f32 %v1983_v37, %v2554_v60 }
 0x1b8   :  { %v366_v12 = vpop.xlane.xlu0 %365  ;;  %1994 = vrsqrt.f32 %v448_v39  ;;  %v418_v50 = vmul.f32 0.03125, %v364_v25  ;;  %v507_v46 = vmul.f32 %v1985_v24, %v2544_v51 }
 0x1b9   :  { %v419_v19 = vmul.f32 0.03125, %v366_v12  ;;  %1996 = vrsqrt.f32 %v449_v38  ;;  %1778 = vmatprep.mubr.f32.mxu0 %v583_v13  ;;  %v545_v47 = vmul.f32 %v2760_v30, %v506_v18 }
 0x1ba   :  { %v1987_v26 = vpop.eup %1986  ;;  %v450_v27 = vadd.f32 1e-05, %v418_v50  ;;  %v546_v53 = vmul.f32 %v2760_v30, %v507_v46 }
 0x1bb   :  { %v451_v52 = vadd.f32 1e-05, %v419_v19  ;;  %v1989_v54 = vpop.eup %1988  ;;  %v368_v14 = vpop.xlane.xlu1 %367  ;;  %v584_v20 = vadd.f32 %v2763_v5, %v545_v47  ;;  %v508_v60 = vmul.f32 %v1987_v26, %v2558_v61 }
 0x1bc   :  { %v370_v15 = vpop.xlane.xlu0 %369  ;;  %1998 = vrsqrt.f32 %v450_v27  ;;  %v420_v28 = vmul.f32 0.03125, %v368_v14  ;;  %v585_v51 = vadd.f32 %v2763_v5, %v546_v53  ;;  %v509_v63 = vmul.f32 %v1989_v54, %v2568_v34 }
 0x1bd   :  { %v421_v29 = vmul.f32 0.03125, %v370_v15  ;;  %2000 = vrsqrt.f32 %v451_v52  ;;  %1779 = vmatmul.mubr.f32.vlgmr.msra.gmra.mrb[0].mxu0 %v584_v20  ;;  %v547_v62 = vmul.f32 %v2760_v30, %v508_v60 }
 0x1be   :  { %v1991_v10 = vpop.eup %1990  ;;  %v452_v31 = vadd.f32 1e-05, %v420_v28  ;;  %1781 = vmatprep.mubr.f32.mxu0 %v585_v51  ;;  %v548_v36 = vmul.f32 %v2760_v30, %v509_v63 }
 0x1bf   :  { %v453_v22 = vadd.f32 1e-05, %v421_v29  ;;  %v1993_v23 = vpop.eup %1992  ;;  %v372_v17 = vpop.xlane.xlu1 %371  ;;  %v586_v61 = vadd.f32 %v2763_v5, %v547_v62  ;;  %v510_v37 = vmul.f32 %v1991_v10, %v2572_v35 }
 0x1c0   :  { %v374_v4 = vpop.xlane.xlu0 %373  ;;  %2002 = vrsqrt.f32 %v452_v31  ;;  %v422_v39 = vmul.f32 0.03125, %v372_v17  ;;  %v511_v24 = vmul.f32 %v1993_v23, %v2582_v43  ;;  %v587_v34 = vadd.f32 %v2763_v5, %v548_v36 }
 0x1c1   :  { %v423_v38 = vmul.f32 0.03125, %v374_v4  ;;  %2004 = vrsqrt.f32 %v453_v22  ;;  %1782 = vmatmul.mubr.f32.gmra.mrb[2].mxu0 %v586_v61  ;;  %v549_v25 = vmul.f32 %v2760_v30, %v510_v37 }
 0x1c2   :  { %v1995_v12 = vpop.eup %1994  ;;  %v454_v13 = vadd.f32 1e-05, %v422_v39  ;;  %v550_v50 = vmul.f32 %v2760_v30, %v511_v24  ;;  %1784 = vmatprep.mubr.f32.mxu0 %v587_v34 }
 0x1c3   :  { %v455_v18 = vadd.f32 1e-05, %v423_v38  ;;  %v1997_v19 = vpop.eup %1996  ;;  %v376_v46 = vpop.xlane.xlu1 %375  ;;  %v588_v47 = vadd.f32 %v2763_v5, %v549_v25  ;;  %v512_v26 = vmul.f32 %v1995_v12, %v2586_v44 }
 0x1c4   :  { %v378_v35 = vpop.xlane.xlu0 %377  ;;  %2006 = vrsqrt.f32 %v454_v13  ;;  %v424_v43 = vmul.f32 0.03125, %v376_v46  ;;  %v589_v52 = vadd.f32 %v2763_v5, %v550_v50  ;;  %v513_v54 = vmul.f32 %v1997_v19, %v2596_v55 }
 0x1c5   :  { %v425_v27 = vmul.f32 0.03125, %v378_v35  ;;  %2008 = vrsqrt.f32 %v455_v18  ;;  %1785 = vmatmul.mubr.f32.gmra.mrb[4].mxu0 %v588_v47  ;;  %v551_v53 = vmul.f32 %v2760_v30, %v512_v26 }
 0x1c6   :  { %v1999_v14 = vpop.eup %1998  ;;  %v456_v15 = vadd.f32 1e-05, %v424_v43  ;;  %1787 = vmatprep.mubr.f32.mxu0 %v589_v52  ;;  %v552_v51 = vmul.f32 %v2760_v30, %v513_v54 }
 0x1c7   :  { %v457_v20 = vadd.f32 1e-05, %v425_v27  ;;  %v2001_v60 = vpop.eup %2000  ;;  %v380_v28 = vpop.xlane.xlu1 %379  ;;  %v590_v44 = vadd.f32 %v2763_v5, %v551_v53  ;;  %v514_v62 = vmul.f32 %v1999_v14, %v2600_v8 }
 0x1c8   :  { %v382_v29 = vpop.xlane.xlu0 %381  ;;  %2010 = vrsqrt.f32 %v456_v15  ;;  %v426_v63 = vmul.f32 0.03125, %v380_v28  ;;  %v515_v31 = vmul.f32 %v2001_v60, %v2610_v2  ;;  %v591_v55 = vadd.f32 %v2763_v5, %v552_v51 }
 0x1c9   :  { %v427_v10 = vmul.f32 0.03125, %v382_v29  ;;  %2012 = vrsqrt.f32 %v457_v20  ;;  %1788 = vmatmul.mubr.f32.gmra.mrb[6].mxu0 %v590_v44  ;;  %v553_v22 = vmul.f32 %v2760_v30, %v514_v62 }
 0x1ca   :  { %v2003_v23 = vpop.eup %2002  ;;  %v458_v17 = vadd.f32 1e-05, %v426_v63  ;;  %v554_v61 = vmul.f32 %v2760_v30, %v515_v31  ;;  %1790 = vmatprep.mubr.f32.mxu0 %v591_v55 }
 0x1cb   :  { %v459_v4 = vadd.f32 1e-05, %v427_v10  ;;  %v2005_v36 = vpop.eup %2004  ;;  %v384_v37 = vpop.xlane.xlu1 %383  ;;  %v592_v39 = vadd.f32 %v2763_v5, %v553_v22  ;;  %v516_v38 = vmul.f32 %v2003_v23, %v2614_v3 }
 0x1cc   :  { %v386_v8 = vpop.xlane.xlu0 %385  ;;  %2014 = vrsqrt.f32 %v458_v17  ;;  %v428_v2 = vmul.f32 0.03125, %v384_v37  ;;  %v593_v34 = vadd.f32 %v2763_v5, %v554_v61  ;;  %v517_v12 = vmul.f32 %v2005_v36, %v2624_v42 }
 0x1cd   :  { %v429_v24 = vmul.f32 0.03125, %v386_v8  ;;  %2016 = vrsqrt.f32 %v459_v4  ;;  %1791 = vmatmul.mubr.f32.gmra.mrb[8].mxu0 %v592_v39  ;;  %v555_v25 = vmul.f32 %v2760_v30, %v516_v38 }
 0x1ce   :  { %v2007_v13 = vpop.eup %2006  ;;  %v460_v18 = vadd.f32 1e-05, %v428_v2  ;;  %1793 = vmatprep.mubr.f32.mxu0 %v593_v34  ;;  %v556_v47 = vmul.f32 %v2760_v30, %v517_v12 }
 0x1cf   :  { %v461_v50 = vadd.f32 1e-05, %v429_v24  ;;  %v2009_v19 = vpop.eup %2008  ;;  %v388_v46 = vpop.xlane.xlu1 %387  ;;  %v594_v3 = vadd.f32 %v2763_v5, %v555_v25  ;;  %v518_v26 = vmul.f32 %v2007_v13, %v2628_v6 }
 0x1d0   :  { %v390_v35 = vpop.xlane.xlu0 %389  ;;  %2018 = vrsqrt.f32 %v460_v18  ;;  %v430_v43 = vmul.f32 0.03125, %v388_v46  ;;  %v519_v52 = vmul.f32 %v2009_v19, %v2638_v9  ;;  %v595_v42 = vadd.f32 %v2763_v5, %v556_v47 }
 0x1d1   :  { %v431_v27 = vmul.f32 0.03125, %v390_v35  ;;  %2020 = vrsqrt.f32 %v461_v50  ;;  %1794 = vmatmul.mubr.f32.gmra.mrb[10].mxu0 %v594_v3  ;;  %v557_v53 = vmul.f32 %v2760_v30, %v518_v26 }
 0x1d2   :  { %v2011_v54 = vpop.eup %2010  ;;  %v462_v14 = vadd.f32 1e-05, %v430_v43  ;;  %v558_v20 = vmul.f32 %v2760_v30, %v519_v52  ;;  %1796 = vmatprep.mubr.f32.mxu0 %v595_v42 }
 0x1d3   :  { %v463_v15 = vadd.f32 1e-05, %v431_v27  ;;  %v2013_v60 = vpop.eup %2012  ;;  %v392_v28 = vpop.xlane.xlu1 %391  ;;  %v596_v29 = vadd.f32 %v2763_v5, %v557_v53  ;;  %v520_v44 = vmul.f32 %v2011_v54, %v2642_v56 }
 0x1d4   :  { %v394_v6 = vpop.xlane.xlu0 %393  ;;  %2022 = vrsqrt.f32 %v462_v14  ;;  %v432_v9 = vmul.f32 0.03125, %v392_v28  ;;  %v597_v62 = vadd.f32 %v2763_v5, %v558_v20  ;;  %v521_v10 = vmul.f32 %v2013_v60, %v2652_v32 }
 0x1d5   :  { %v433_v51 = vmul.f32 0.03125, %v394_v6  ;;  %2024 = vrsqrt.f32 %v463_v15  ;;  %1797 = vmatmul.mubr.f32.gmra.mrb[12].mxu0 %v596_v29  ;;  %v559_v63 = vmul.f32 %v2760_v30, %v520_v44 }
 0x1d6   :  { %v2015_v31 = vpop.eup %2014  ;;  %v464_v55 = vadd.f32 1e-05, %v432_v9  ;;  %1799 = vmatprep.mubr.f32.mxu0 %v597_v62  ;;  %v560_v61 = vmul.f32 %v2760_v30, %v521_v10 }
 0x1d7   :  { %v465_v22 = vadd.f32 1e-05, %v433_v51  ;;  %v2017_v23 = vpop.eup %2016  ;;  %v396_v17 = vpop.xlane.xlu1 %395  ;;  %v598_v56 = vadd.f32 %v2763_v5, %v559_v63  ;;  %v522_v36 = vmul.f32 %v2015_v31, %v2656_v33 }
 0x1d8   :  { %v398_v4 = vpop.xlane.xlu0 %397  ;;  %2026 = vrsqrt.f32 %v464_v55  ;;  %v434_v37 = vmul.f32 0.03125, %v396_v17  ;;  %v523_v39 = vmul.f32 %v2017_v23, %v2666_v7  ;;  %v599_v32 = vadd.f32 %v2763_v5, %v560_v61 }
 0x1d9   :  { %v435_v8 = vmul.f32 0.03125, %v398_v4  ;;  %2028 = vrsqrt.f32 %v465_v22  ;;  %1800 = vmatmul.mubr.f32.gmra.mrb[14].mxu0 %v598_v56  ;;  %v561_v38 = vmul.f32 %v2760_v30, %v522_v36 }
 0x1da   :  { %v2019_v2 = vpop.eup %2018  ;;  %v466_v24 = vadd.f32 1e-05, %v434_v37  ;;  %v562_v25 = vmul.f32 %v2760_v30, %v523_v39  ;;  %1802 = vmatprep.mubr.f32.mxu0 %v599_v32 }
 0x1db   :  { %v467_v34 = vadd.f32 1e-05, %v435_v8  ;;  %v2021_v12 = vpop.eup %2020  ;;  %v400_v13 = vpop.xlane.xlu1 %399  ;;  %v600_v18 = vadd.f32 %v2763_v5, %v561_v38  ;;  %v524_v50 = vmul.f32 %v2019_v2, %v2670_v45 }
 0x1dc   :  { %v402_v33 = vpop.xlane.xlu0 %401  ;;  %2030 = vrsqrt.f32 %v466_v24  ;;  %v436_v7 = vmul.f32 0.03125, %v400_v13  ;;  %v601_v46 = vadd.f32 %v2763_v5, %v562_v25  ;;  %v525_v3 = vmul.f32 %v2021_v12, %v2680_v57 }
 0x1dd   :  { %v437_v19 = vmul.f32 0.03125, %v402_v33  ;;  %2032 = vrsqrt.f32 %v467_v34  ;;  %1803 = vmatmul.mubr.f32.gmra.mrb[16].mxu0 %v600_v18  ;;  %v563_v35 = vmul.f32 %v2760_v30, %v524_v50 }
 0x1de   :  { %v2023_v47 = vpop.eup %2022  ;;  %v468_v26 = vadd.f32 1e-05, %v436_v7  ;;  %1805 = vmatprep.mubr.f32.mxu0 %v601_v46  ;;  %v564_v53 = vmul.f32 %v2760_v30, %v525_v3 }
 0x1df   :  { %v469_v43 = vadd.f32 1e-05, %v437_v19  ;;  %v2025_v27 = vpop.eup %2024  ;;  %v404_v52 = vpop.xlane.xlu1 %403  ;;  %v602_v45 = vadd.f32 %v2763_v5, %v563_v35  ;;  %v526_v54 = vmul.f32 %v2023_v47, %v2684_v58  ;;  %v1158_v35 = vld [vmem:[#allocation13 + $0x38] sm:$0xff]  ;;  %v1159_v47 = vld [vmem:[#allocation13 + $0x40] sm:$0xff] }
 0x1e0   :  { %v406_v42 = vpop.xlane.xlu0 %405  ;;  %2034 = vrsqrt.f32 %v468_v26  ;;  %v438_v14 = vmul.f32 0.03125, %v404_v52  ;;  %v527_v20 = vmul.f32 %v2025_v27, %v2694_v11  ;;  %v603_v57 = vadd.f32 %v2763_v5, %v564_v53  ;;  %v1160_v26 = vld [vmem:[#allocation13 + $0x48] sm:$0xff]  ;;  %v1162_v27 = vld [vmem:[#allocation13 + $0x58] sm:$0xff] }
 0x1e1   :  { %v439_v15 = vmul.f32 0.03125, %v406_v42  ;;  %2036 = vrsqrt.f32 %v469_v43  ;;  %1806 = vmatmul.mubr.f32.gmra.mrb[18].mxu0 %v602_v45  ;;  %v565_v60 = vmul.f32 %v2760_v30, %v526_v54  ;;  %v1954_v43 = vpack.c.bf16 %v1160_v26, %v1159_v47  ;;  %v1164_v42 = vld [vmem:[#allocation13 + $0x68] sm:$0xff]  ;;  %v1166_v53 = vld [vmem:[#allocation13 + $0x78] sm:$0xff] }
 0x1e2   :  { %v2027_v28 = vpop.eup %2026  ;;  %v470_v6 = vadd.f32 1e-05, %v438_v14  ;;  %v566_v44 = vmul.f32 %v2760_v30, %v527_v20  ;;  %1808 = vmatprep.mubr.f32.mxu0 %v603_v57  ;;  %v2860_v14 = vld [vmem:[#allocation12] ss:$0 sm:$0xff] }
 0x1e3   :  { %v471_v29 = vadd.f32 1e-05, %v439_v15  ;;  %v2029_v9 = vpop.eup %2028  ;;  %v408_v51 = vpop.xlane.xlu1 %407  ;;  %v604_v58 = vadd.f32 %v2763_v5, %v565_v60  ;;  %v528_v62 = vmul.f32 %v2027_v28, %v2698_v16 }
 0x1e4   :  { %2038 = vrsqrt.f32 %v470_v6  ;;  %v440_v11 = vmul.f32 0.03125, %v408_v51  ;;  %v605_v63 = vadd.f32 %v2763_v5, %v566_v44  ;;  %v529_v10 = vmul.f32 %v2029_v9, %v2708_v40 }
 0x1e5   :  { %2040 = vrsqrt.f32 %v471_v29  ;;  %1809 = vmatmul.mubr.f32.gmra.mrb[20].mxu0 %v604_v58  ;;  %v567_v31 = vmul.f32 %v2760_v30, %v528_v62 }
 0x1e6   :  { %v2031_v55 = vpop.eup %2030  ;;  %v472_v22 = vadd.f32 1e-05, %v440_v11  ;;  %1811 = vmatprep.mubr.f32.mxu0 %v605_v63  ;;  %v568_v23 = vmul.f32 %v2760_v30, %v529_v10 }
 0x1e7   :  { %v2033_v17 = vpop.eup %2032  ;;  %v606_v4 = vadd.f32 %v2763_v5, %v567_v31  ;;  %v530_v16 = vmul.f32 %v2031_v55, %v2712_v41 }
 0x1e8   :  { %2042 = vrsqrt.f32 %v472_v22  ;;  %v607_v56 = vadd.f32 %v2763_v5, %v568_v23  ;;  %v531_v61 = vmul.f32 %v2033_v17, %v2722_v48 }
 0x1e9   :  { %1812 = vmatmul.mubr.f32.gmra.mrb[22].mxu0 %v606_v4  ;;  %v569_v40 = vmul.f32 %v2760_v30, %v530_v16 }
 0x1ea   :  { %v2035_v36 = vpop.eup %2034  ;;  %1814 = vmatprep.mubr.f32.mxu0 %v607_v56  ;;  %v570_v37 = vmul.f32 %v2760_v30, %v531_v61 }
 0x1eb   :  { %v2037_v8 = vpop.eup %2036  ;;  %v608_v39 = vadd.f32 %v2763_v5, %v569_v40  ;;  %v532_v32 = vmul.f32 %v2035_v36, %v2726_v49 }
 0x1ec   :  { %v609_v38 = vadd.f32 %v2763_v5, %v570_v37  ;;  %v533_v41 = vmul.f32 %v2037_v8, %v2736_v21 }
 0x1ed   :  { %1815 = vmatmul.mubr.f32.gmra.mrb[24].mxu0 %v608_v39  ;;  %v571_v2 = vmul.f32 %v2760_v30, %v532_v32 }
 0x1ee   :  { %v2039_v48 = vpop.eup %2038  ;;  %1817 = vmatprep.mubr.f32.mxu0 %v609_v38  ;;  %v572_v24 = vmul.f32 %v2760_v30, %v533_v41 }
 0x1ef   :  { %v2041_v34 = vpop.eup %2040  ;;  %v610_v25 = vadd.f32 %v2763_v5, %v571_v2  ;;  %v534_v12 = vmul.f32 %v2039_v48, %v2740_v59 }
 0x1f0   :  { %v611_v13 = vadd.f32 %v2763_v5, %v572_v24  ;;  %v535_v49 = vmul.f32 %v2041_v34, %v2750_v0  ;;  %v1157_v0 = vld [vmem:[#allocation13 + $0x30] sm:$0xff] }
 0x1f1   :  { %1818 = vmatmul.mubr.f32.gmra.mrb[26].mxu0 %v610_v25  ;;  %v573_v33 = vmul.f32 %v2760_v30, %v534_v12  ;;  %v1950_v3 = vpack.c.bf16 %v1158_v35, %v1157_v0 }
 0x1f2   :  { %v2043_v21 = vpop.eup %2042  ;;  %1820 = vmatprep.mubr.f32.mxu0 %v611_v13  ;;  %v574_v18 = vmul.f32 %v2760_v30, %v535_v49 }
 0x1f3   :  { %v612_v50 = vadd.f32 %v2763_v5, %v573_v33  ;;  %v536_v7 = vmul.f32 %v2043_v21, %v2754_v1  ;;  %1951 = vmatprep.subr.bf16.mxu1 %v1950_v3  ;;  %v1161_v1 = vld [vmem:[#allocation13 + $0x50] sm:$0xff] }
 0x1f4   :  { %v613_v19 = vadd.f32 %v2763_v5, %v574_v18  ;;  %1953 = vmatpush3.bf16.msra.mxu1 %v1950_v3  ;;  %v1958_v52 = vpack.c.bf16 %v1162_v27, %v1161_v1 }
 0x1f5   :  { %1821 = vmatmul.mubr.f32.gmra.mrb[28].mxu0 %v612_v50  ;;  %v575_v59 = vmul.f32 %v2760_v30, %v536_v7  ;;  %1955 = vmatprep.subr.bf16.mxu1 %v1954_v43  ;;  %v1163_v30 = vld [vmem:[#allocation13 + $0x60] sm:$0xff] }
 0x1f6   :  { %1823 = vmatprep.mubr.f32.mxu0 %v613_v19  ;;  %v1962_v45 = vpack.c.bf16 %v1164_v42, %v1163_v30 }
 0x1f7   :  { %v614_v46 = vadd.f32 %v2763_v5, %v575_v59  ;;  %v1165_v5 = vld [vmem:[#allocation13 + $0x70] sm:$0xff] }
 0x1f8   :  { %1957 = vmatpush3.bf16.msra.mxu1 %v1954_v43  ;;  %v1966_v54 = vpack.c.bf16 %v1166_v53, %v1165_v5 }
 0x1f9   :  { %1824 = vmatmul.mubr.f32.gmra.mrb[30].mxu0 %v614_v46  ;;  %1959 = vmatprep.subr.bf16.mxu1 %v1958_v52 }
 0x1fc   :  { %1961 = vmatpush3.bf16.msra.mxu1 %v1958_v52 }
 0x1fd   :  { %1963 = vmatprep.subr.bf16.mxu1 %v1962_v45 }
 0x200   :  { %1965 = vmatpush3.bf16.msra.mxu1 %v1962_v45 }
 0x201   :  { %1967 = vmatprep.subr.bf16.mxu1 %v1966_v54 }
 0x204   :  { %1969 = vmatpush3.bf16.msra.mxu1 %v1966_v54 }
 0x290   :  { %v1780_v15 = vpop.f32.mrb[0].mxu0 }
 0x291   :  { %v806_v20 = vadd.f32 %v1780_v15, %v2860_v14  ;;  %v800_v57 = vpop.f32.mrb[1].mxu0 }
 0x292   :  { %v801_v60 = vadd.f32 %v2860_v14, %v800_v57 }
 0x293   :  { %v992_v28 = vmul.f32 0.70710677, %v806_v20  ;;  %v960_v2 = vmul.f32 0.5, %v806_v20 }
 0x294   :  { %v991_v6 = vmul.f32 0.70710677, %v801_v60  ;;  %v1783_v29 = vpop.f32.mrb[2].mxu0  ;;  %v959_v38 = vmul.f32 0.5, %v801_v60 }
 0x295   :  { %2044 = verf.f32 %v992_v28  ;;  %v816_v44 = vadd.f32 %v1783_v29, %v2860_v14  ;;  %v810_v9 = vpop.f32.mrb[3].mxu0 }
 0x296   :  { %2046 = verf.f32 %v991_v6  ;;  %v811_v51 = vadd.f32 %v2860_v14, %v810_v9 }
 0x297   :  { %v994_v58 = vmul.f32 0.70710677, %v816_v44  ;;  %v962_v59 = vmul.f32 0.5, %v816_v44 }
 0x298   :  { %v993_v62 = vmul.f32 0.70710677, %v811_v51  ;;  %v1786_v11 = vpop.f32.mrb[4].mxu0  ;;  %v961_v18 = vmul.f32 0.5, %v811_v51 }
 0x299   :  { %2048 = verf.f32 %v994_v58  ;;  %v826_v63 = vadd.f32 %v1786_v11, %v2860_v14  ;;  %v820_v10 = vpop.f32.mrb[5].mxu0 }
 0x29a   :  { %2050 = verf.f32 %v993_v62  ;;  %v821_v31 = vadd.f32 %v2860_v14, %v820_v10 }
 0x29b   :  { %v996_v55 = vmul.f32 0.70710677, %v826_v63  ;;  %v964_v5 = vmul.f32 0.5, %v826_v63 }
 0x29c   :  { %v995_v22 = vmul.f32 0.70710677, %v821_v31  ;;  %v1789_v23 = vpop.f32.mrb[6].mxu0  ;;  %v963_v52 = vmul.f32 0.5, %v821_v31 }
 0x29d   :  { %2052 = verf.f32 %v996_v55  ;;  %v2869_v17 = vadd.f32 %v1789_v23, %v2860_v14  ;;  %v830_v4 = vpop.f32.mrb[7].mxu0 }
 0x29e   :  { %2054 = verf.f32 %v995_v22  ;;  %v831_v16 = vadd.f32 %v2860_v14, %v830_v4 }
 0x29f   :  { %v2045_v56 = vpop.eup %2044  ;;  %v998_v61 = vmul.f32 0.70710677, %v2869_v17  ;;  %v966_v62 = vmul.f32 0.5, %v2869_v17 }
 0x2a0   :  { %v2047_v40 = vpop.eup %2046  ;;  %v1056_v36 = vadd.f32 1.0, %v2045_v56  ;;  %v997_v37 = vmul.f32 0.70710677, %v831_v16  ;;  %v1792_v8 = vpop.f32.mrb[8].mxu0  ;;  %v965_v44 = vmul.f32 0.5, %v831_v16 }
 0x2a1   :  { %2056 = verf.f32 %v998_v61  ;;  %v2874_v39 = vadd.f32 %v1792_v8, %v2860_v14  ;;  %v840_v32 = vpop.f32.mrb[9].mxu0  ;;  %v1055_v41 = vadd.f32 1.0, %v2047_v40 }
 0x2a2   :  { %2058 = verf.f32 %v997_v37  ;;  %v2877_v48 = vadd.f32 %v2860_v14, %v840_v32  ;;  %v1088_v21 = vmul.f32 %v1056_v36, %v960_v2 }
 0x2a3   :  { %v2049_v24 = vpop.eup %2048  ;;  %v1000_v34 = vmul.f32 0.70710677, %v2874_v39  ;;  %v1087_v25 = vmul.f32 %v1055_v41, %v959_v38  ;;  %v968_v36 = vmul.f32 0.5, %v2874_v39 }
 0x2a4   :  { %v2051_v12 = vpop.eup %2050  ;;  %v1058_v13 = vadd.f32 1.0, %v2049_v24  ;;  %v999_v49 = vmul.f32 0.70710677, %v2877_v48  ;;  %v1795_v33 = vpop.f32.mrb[10].mxu0  ;;  %v967_v56 = vmul.f32 0.5, %v2877_v48 }
 0x2a5   :  { %v1057_v50 = vadd.f32 1.0, %v2051_v12  ;;  %2060 = verf.f32 %v1000_v34  ;;  %v2882_v7 = vadd.f32 %v1795_v33, %v2860_v14  ;;  %v850_v19 = vpop.f32.mrb[11].mxu0  ;;  %1858 = vmatprep.mubr.f32.mxu1 %v1087_v25 }
 0x2a6   :  { %2062 = verf.f32 %v999_v49  ;;  %v2885_v46 = vadd.f32 %v2860_v14, %v850_v19  ;;  %1859 = vmatmul.mubr.f32.vlgmr.msra.gmra.mrb[0].mxu1 %v1088_v21  ;;  %v1090_v27 = vmul.f32 %v1058_v13, %v962_v59 }
 0x2a7   :  { %v2053_v0 = vpop.eup %2052  ;;  %v1002_v35 = vmul.f32 0.70710677, %v2882_v7  ;;  %v1089_v3 = vmul.f32 %v1057_v50, %v961_v18  ;;  %v970_v49 = vmul.f32 0.5, %v2882_v7 }
 0x2a8   :  { %v2055_v47 = vpop.eup %2054  ;;  %v1060_v26 = vadd.f32 1.0, %v2053_v0  ;;  %v1001_v43 = vmul.f32 0.70710677, %v2885_v46  ;;  %v1798_v1 = vpop.f32.mrb[12].mxu0  ;;  %v969_v25 = vmul.f32 0.5, %v2885_v46 }
 0x2a9   :  { %v1059_v30 = vadd.f32 1.0, %v2055_v47  ;;  %2064 = verf.f32 %v1002_v35  ;;  %v2890_v42 = vadd.f32 %v1798_v1, %v2860_v14  ;;  %v860_v45 = vpop.f32.mrb[13].mxu0  ;;  %1861 = vmatprep.mubr.f32.mxu1 %v1089_v3 }
 0x2aa   :  { %2066 = verf.f32 %v1001_v43  ;;  %v2893_v53 = vadd.f32 %v2860_v14, %v860_v45  ;;  %1862 = vmatmul.mubr.f32.gmra.mrb[2].mxu1 %v1090_v27  ;;  %v1092_v29 = vmul.f32 %v1060_v26, %v964_v5 }
 0x2ab   :  { %v2057_v54 = vpop.eup %2056  ;;  %v1004_v15 = vmul.f32 0.70710677, %v2890_v42  ;;  %v1091_v20 = vmul.f32 %v1059_v30, %v963_v52  ;;  %v972_v43 = vmul.f32 0.5, %v2890_v42 }
 0x2ac   :  { %v2059_v57 = vpop.eup %2058  ;;  %v1062_v60 = vadd.f32 1.0, %v2057_v54  ;;  %v1003_v28 = vmul.f32 0.70710677, %v2893_v53  ;;  %v1801_v6 = vpop.f32.mrb[14].mxu0  ;;  %v971_v3 = vmul.f32 0.5, %v2893_v53 }
 0x2ad   :  { %v1061_v9 = vadd.f32 1.0, %v2059_v57  ;;  %2068 = verf.f32 %v1004_v15  ;;  %v2898_v51 = vadd.f32 %v1801_v6, %v2860_v14  ;;  %v870_v58 = vpop.f32.mrb[15].mxu0  ;;  %1864 = vmatprep.mubr.f32.mxu1 %v1091_v20 }
 0x2ae   :  { %2070 = verf.f32 %v1003_v28  ;;  %v2902_v11 = vadd.f32 %v2860_v14, %v870_v58  ;;  %1865 = vmatmul.mubr.f32.gmra.mrb[4].mxu1 %v1092_v29  ;;  %v1094_v16 = vmul.f32 %v1062_v60, %v966_v62 }
 0x2af   :  { %v2061_v63 = vpop.eup %2060  ;;  %v1006_v10 = vmul.f32 0.70710677, %v2898_v51  ;;  %v1093_v31 = vmul.f32 %v1061_v9, %v965_v44  ;;  %v974_v28 = vmul.f32 0.5, %v2898_v51 }
 0x2b0   :  { %v2063_v55 = vpop.eup %2062  ;;  %v1064_v22 = vadd.f32 1.0, %v2061_v63  ;;  %v1005_v23 = vmul.f32 0.70710677, %v2902_v11  ;;  %v1804_v4 = vpop.f32.mrb[16].mxu0  ;;  %v973_v20 = vmul.f32 0.5, %v2902_v11 }
 0x2b1   :  { %v1063_v61 = vadd.f32 1.0, %v2063_v55  ;;  %2072 = verf.f32 %v1006_v10  ;;  %v2908_v17 = vadd.f32 %v1804_v4, %v2860_v14  ;;  %v880_v40 = vpop.f32.mrb[17].mxu0  ;;  %1867 = vmatprep.mubr.f32.mxu1 %v1093_v31 }
 0x2b2   :  { %2074 = verf.f32 %v1005_v23  ;;  %v2912_v37 = vadd.f32 %v2860_v14, %v880_v40  ;;  %1868 = vmatmul.mubr.f32.gmra.mrb[6].mxu1 %v1094_v16  ;;  %v1096_v34 = vmul.f32 %v1064_v22, %v968_v36 }
 0x2b3   :  { %v2065_v8 = vpop.eup %2064  ;;  %v1008_v32 = vmul.f32 0.70710677, %v2908_v17  ;;  %v1095_v38 = vmul.f32 %v1063_v61, %v967_v56  ;;  %v976_v23 = vmul.f32 0.5, %v2908_v17 }
 0x2b4   :  { %v2067_v41 = vpop.eup %2066  ;;  %v1066_v2 = vadd.f32 1.0, %v2065_v8  ;;  %v1007_v48 = vmul.f32 0.70710677, %v2912_v37  ;;  %v1807_v24 = vpop.f32.mrb[18].mxu0  ;;  %v975_v31 = vmul.f32 0.5, %v2912_v37 }
 0x2b5   :  { %v1065_v12 = vadd.f32 1.0, %v2067_v41  ;;  %2076 = verf.f32 %v1008_v32  ;;  %v2918_v39 = vadd.f32 %v1807_v24, %v2860_v14  ;;  %v890_v13 = vpop.f32.mrb[19].mxu0  ;;  %1870 = vmatprep.mubr.f32.mxu1 %v1095_v38 }
 0x2b6   :  { %2078 = verf.f32 %v1007_v48  ;;  %v2922_v33 = vadd.f32 %v2860_v14, %v890_v13  ;;  %1871 = vmatmul.mubr.f32.gmra.mrb[8].mxu1 %v1096_v34  ;;  %v1098_v35 = vmul.f32 %v1066_v2, %v970_v49 }
 0x2b7   :  { %v2069_v21 = vpop.eup %2068  ;;  %v1010_v18 = vmul.f32 0.70710677, %v2918_v39  ;;  %v1097_v50 = vmul.f32 %v1065_v12, %v969_v25  ;;  %v978_v48 = vmul.f32 0.5, %v2918_v39 }
 0x2b8   :  { %v2071_v19 = vpop.eup %2070  ;;  %v1068_v59 = vadd.f32 1.0, %v2069_v21  ;;  %v1009_v46 = vmul.f32 0.70710677, %v2922_v33  ;;  %v1810_v0 = vpop.f32.mrb[20].mxu0  ;;  %v977_v38 = vmul.f32 0.5, %v2922_v33 }
 0x2b9   :  { %v1067_v47 = vadd.f32 1.0, %v2071_v19  ;;  %2080 = verf.f32 %v1010_v18  ;;  %v2928_v7 = vadd.f32 %v1810_v0, %v2860_v14  ;;  %v900_v26 = vpop.f32.mrb[21].mxu0  ;;  %1873 = vmatprep.mubr.f32.mxu1 %v1097_v50 }
 0x2ba   :  { %2082 = verf.f32 %v1009_v46  ;;  %v2932_v1 = vadd.f32 %v2860_v14, %v900_v26  ;;  %1874 = vmatmul.mubr.f32.gmra.mrb[10].mxu1 %v1098_v35  ;;  %v1100_v15 = vmul.f32 %v1068_v59, %v972_v43 }
 0x2bb   :  { %v2073_v27 = vpop.eup %2072  ;;  %v1012_v52 = vmul.f32 0.70710677, %v2928_v7  ;;  %v1099_v30 = vmul.f32 %v1067_v47, %v971_v3  ;;  %v980_v46 = vmul.f32 0.5, %v2928_v7 }
 0x2bc   :  { %v2075_v45 = vpop.eup %2074  ;;  %v1070_v5 = vadd.f32 1.0, %v2073_v27  ;;  %v1011_v53 = vmul.f32 0.70710677, %v2932_v1  ;;  %v1813_v54 = vpop.f32.mrb[22].mxu0  ;;  %v979_v50 = vmul.f32 0.5, %v2932_v1 }
 0x2bd   :  { %v1069_v57 = vadd.f32 1.0, %v2075_v45  ;;  %2084 = verf.f32 %v1012_v52  ;;  %v2938_v42 = vadd.f32 %v1813_v54, %v2860_v14  ;;  %v910_v60 = vpop.f32.mrb[23].mxu0  ;;  %1876 = vmatprep.mubr.f32.mxu1 %v1099_v30 }
 0x2be   :  { %2086 = verf.f32 %v1011_v53  ;;  %v2942_v6 = vadd.f32 %v2860_v14, %v910_v60  ;;  %1877 = vmatmul.mubr.f32.gmra.mrb[12].mxu1 %v1100_v15  ;;  %v1102_v10 = vmul.f32 %v1070_v5, %v974_v28 }
 0x2bf   :  { %v2077_v29 = vpop.eup %2076  ;;  %v1014_v44 = vmul.f32 0.70710677, %v2938_v42  ;;  %v1101_v9 = vmul.f32 %v1069_v57, %v973_v20  ;;  %v982_v7 = vmul.f32 0.5, %v2938_v42 }
 0x2c0   :  { %v2079_v58 = vpop.eup %2078  ;;  %v1072_v62 = vadd.f32 1.0, %v2077_v29  ;;  %v1013_v11 = vmul.f32 0.70710677, %v2942_v6  ;;  %v1816_v63 = vpop.f32.mrb[24].mxu0  ;;  %v981_v30 = vmul.f32 0.5, %v2942_v6 }
 0x2c1   :  { %v1071_v55 = vadd.f32 1.0, %v2079_v58  ;;  %2088 = verf.f32 %v1014_v44  ;;  %v2948_v51 = vadd.f32 %v1816_v63, %v2860_v14  ;;  %v920_v22 = vpop.f32.mrb[25].mxu0  ;;  %1879 = vmatprep.mubr.f32.mxu1 %v1101_v9 }
 0x2c2   :  { %2090 = verf.f32 %v1013_v11  ;;  %v2952_v4 = vadd.f32 %v2860_v14, %v920_v22  ;;  %1880 = vmatmul.mubr.f32.gmra.mrb[14].mxu1 %v1102_v10  ;;  %v1104_v32 = vmul.f32 %v1072_v62, %v976_v23 }
 0x2c3   :  { %v2081_v16 = vpop.eup %2080  ;;  %v1016_v56 = vmul.f32 0.70710677, %v2948_v51  ;;  %v1103_v61 = vmul.f32 %v1071_v55, %v975_v31  ;;  %v984_v58 = vmul.f32 0.5, %v2948_v51 }
 0x2c4   :  { %v2083_v40 = vpop.eup %2082  ;;  %v1074_v36 = vadd.f32 1.0, %v2081_v16  ;;  %v1015_v37 = vmul.f32 0.70710677, %v2952_v4  ;;  %v1819_v8 = vpop.f32.mrb[26].mxu0  ;;  %v983_v6 = vmul.f32 0.5, %v2952_v4 }
 0x2c5   :  { %v1073_v41 = vadd.f32 1.0, %v2083_v40  ;;  %2092 = verf.f32 %v1016_v56  ;;  %v2958_v17 = vadd.f32 %v1819_v8, %v2860_v14  ;;  %v930_v2 = vpop.f32.mrb[27].mxu0  ;;  %1882 = vmatprep.mubr.f32.mxu1 %v1103_v61 }
 0x2c6   :  { %2094 = verf.f32 %v1015_v37  ;;  %v931_v24 = vadd.f32 %v2860_v14, %v930_v2  ;;  %1883 = vmatmul.mubr.f32.gmra.mrb[16].mxu1 %v1104_v32  ;;  %v1106_v18 = vmul.f32 %v1074_v36, %v978_v48 }
 0x2c7   :  { %v2085_v34 = vpop.eup %2084  ;;  %v1018_v25 = vmul.f32 0.70710677, %v2958_v17  ;;  %v1105_v12 = vmul.f32 %v1073_v41, %v977_v38  ;;  %v986_v55 = vmul.f32 0.5, %v2958_v17 }
 0x2c8   :  { %v2087_v13 = vpop.eup %2086  ;;  %v1076_v49 = vadd.f32 1.0, %v2085_v34  ;;  %v1017_v33 = vmul.f32 0.70710677, %v931_v24  ;;  %v1822_v21 = vpop.f32.mrb[28].mxu0  ;;  %v985_v10 = vmul.f32 0.5, %v931_v24 }
 0x2c9   :  { %v1075_v19 = vadd.f32 1.0, %v2087_v13  ;;  %2096 = verf.f32 %v1018_v25  ;;  %v946_v59 = vadd.f32 %v1822_v21, %v2860_v14  ;;  %v940_v39 = vpop.f32.mrb[29].mxu0  ;;  %1885 = vmatprep.mubr.f32.mxu1 %v1105_v12  ;;  %v2974_v34 = vld [vmem:[#allocation15] ss:$0 sm:$0xff]  ;;  %v1531_v12 = vld [vmem:[#allocation4 + $0x8] sm:$0xff] }
 0x2ca   :  { %2098 = verf.f32 %v1017_v33  ;;  %v941_v0 = vadd.f32 %v2860_v14, %v940_v39  ;;  %1886 = vmatmul.mubr.f32.gmra.mrb[18].mxu1 %v1106_v18  ;;  %v1108_v1 = vmul.f32 %v1076_v49, %v980_v46  ;;  %v1530_v33 = vld [vmem:[#allocation4] sm:$0xff] }
 0x2cb   :  { %v2089_v35 = vpop.eup %2088  ;;  %v1020_v3 = vmul.f32 0.70710677, %v946_v59  ;;  %v1107_v47 = vmul.f32 %v1075_v19, %v979_v50  ;;  %v988_v40 = vmul.f32 0.5, %v946_v59  ;;  %v1533_v59 = vld [vmem:[#allocation4 + $0x18] sm:$0xff] }
 0x2cc   :  { %v2091_v26 = vpop.eup %2090  ;;  %v1078_v43 = vadd.f32 1.0, %v2089_v35  ;;  %v1019_v27 = vmul.f32 0.70710677, %v941_v0  ;;  %v1825_v52 = vpop.f32.mrb[30].mxu0  ;;  %v987_v61 = vmul.f32 0.5, %v941_v0  ;;  %v1532_v0 = vld [vmem:[#allocation4 + $0x10] sm:$0xff] }
 0x2cd   :  { %v1077_v45 = vadd.f32 1.0, %v2091_v26  ;;  %2100 = verf.f32 %v1020_v3  ;;  %v956_v5 = vadd.f32 %v1825_v52, %v2860_v14  ;;  %v950_v53 = vpop.f32.mrb[31].mxu0  ;;  %1888 = vmatprep.mubr.f32.mxu1 %v1107_v47 }
 0x2ce   :  { %2102 = verf.f32 %v1019_v27  ;;  %v951_v54 = vadd.f32 %v2860_v14, %v950_v53  ;;  %1889 = vmatmul.mubr.f32.gmra.mrb[20].mxu1 %v1108_v1  ;;  %v1110_v44 = vmul.f32 %v1078_v43, %v982_v7  ;;  %v1535_v43 = vld [vmem:[#allocation4 + $0x28] sm:$0xff]  ;;  %v1534_v1 = vld [vmem:[#allocation4 + $0x20] sm:$0xff]  ;;  %v1537_v7 = vld [vmem:[#allocation4 + $0x38] sm:$0xff] }
 0x2cf   :  { %v2093_v15 = vpop.eup %2092  ;;  %v1022_v20 = vmul.f32 0.70710677, %v956_v5  ;;  %v1109_v57 = vmul.f32 %v1077_v45, %v981_v30  ;;  %v990_v17 = vmul.f32 0.5, %v956_v5 }
 0x2d0   :  { %v2095_v60 = vpop.eup %2094  ;;  %v1080_v28 = vadd.f32 1.0, %v2093_v15  ;;  %v1021_v29 = vmul.f32 0.70710677, %v951_v54  ;;  %v989_v41 = vmul.f32 0.5, %v951_v54 }
 0x2d1   :  { %v1079_v9 = vadd.f32 1.0, %v2095_v60  ;;  %2104 = verf.f32 %v1022_v20  ;;  %1891 = vmatprep.mubr.f32.mxu1 %v1109_v57  ;;  %v1536_v20 = vld [vmem:[#allocation4 + $0x30] sm:$0xff] }
 0x2d2   :  { %2106 = verf.f32 %v1021_v29  ;;  %1892 = vmatmul.mubr.f32.gmra.mrb[22].mxu1 %v1110_v44  ;;  %v1112_v63 = vmul.f32 %v1080_v28, %v984_v58  ;;  %v1539_v44 = vld [vmem:[#allocation4 + $0x48] sm:$0xff]  ;;  %v1538_v58 = vld [vmem:[#allocation4 + $0x40] sm:$0xff] }
 0x2d3   :  { %v2097_v42 = vpop.eup %2096  ;;  %v1111_v62 = vmul.f32 %v1079_v9, %v983_v6 }
 0x2d4   :  { %v2099_v14 = vpop.eup %2098  ;;  %v1082_v11 = vadd.f32 1.0, %v2097_v42 }
 0x2d5   :  { %v1081_v31 = vadd.f32 1.0, %v2099_v14  ;;  %1894 = vmatprep.mubr.f32.mxu1 %v1111_v62 }
 0x2d6   :  { %1895 = vmatmul.mubr.f32.gmra.mrb[24].mxu1 %v1112_v63  ;;  %v1114_v56 = vmul.f32 %v1082_v11, %v986_v55  ;;  %v1541_v63 = vld [vmem:[#allocation4 + $0x58] sm:$0xff]  ;;  %v1540_v55 = vld [vmem:[#allocation4 + $0x50] sm:$0xff] }
 0x2d7   :  { %v2101_v22 = vpop.eup %2100  ;;  %v1113_v23 = vmul.f32 %v1081_v31, %v985_v10 }
 0x2d8   :  { %v2103_v4 = vpop.eup %2102  ;;  %v1084_v16 = vadd.f32 1.0, %v2101_v22 }
 0x2d9   :  { %v1083_v51 = vadd.f32 1.0, %v2103_v4  ;;  %1897 = vmatprep.mubr.f32.mxu1 %v1113_v23 }
 0x2da   :  { %1898 = vmatmul.mubr.f32.gmra.mrb[26].mxu1 %v1114_v56  ;;  %v1116_v38 = vmul.f32 %v1084_v16, %v988_v40  ;;  %v1543_v56 = vld [vmem:[#allocation4 + $0x68] sm:$0xff]  ;;  %v1542_v40 = vld [vmem:[#allocation4 + $0x60] sm:$0xff] }
 0x2db   :  { %v2105_v36 = vpop.eup %2104  ;;  %v1115_v37 = vmul.f32 %v1083_v51, %v987_v61 }
 0x2dc   :  { %v2107_v8 = vpop.eup %2106  ;;  %v1086_v32 = vadd.f32 1.0, %v2105_v36 }
 0x2dd   :  { %v1085_v2 = vadd.f32 1.0, %v2107_v8  ;;  %1900 = vmatprep.mubr.f32.mxu1 %v1115_v37 }
 0x2de   :  { %1901 = vmatmul.mubr.f32.gmra.mrb[28].mxu1 %v1116_v38  ;;  %v1118_v24 = vmul.f32 %v1086_v32, %v990_v17  ;;  %v1545_v38 = vld [vmem:[#allocation4 + $0x78] sm:$0xff]  ;;  %v1544_v17 = vld [vmem:[#allocation4 + $0x70] sm:$0xff] }
 0x2df   :  { %v1117_v48 = vmul.f32 %v1085_v2, %v989_v41 }
 0x2e1   :  { %1903 = vmatprep.mubr.f32.mxu1 %v1117_v48 }
 0x2e2   :  { %1904 = vmatmul.mubr.f32.gmra.mrb[30].mxu1 %v1118_v24 }
 0x379   :  { %v1860_v25 = vpop.f32.mrb[0].mxu1 }
 0x37a   :  { %v1499_v13 = vadd.f32 %v1860_v25, %v2974_v34  ;;  %v1233_v49 = vpop.f32.mrb[1].mxu1 }
 0x37b   :  { %v1498_v21 = vadd.f32 %v2974_v34, %v1233_v49 }
 0x37c   :  { %v1563_v18 = vadd.f32 %v1531_v12, %v1499_v13  ;;  %v1547_v13 = vld [vmem:[#allocation4 + $0x88] sm:$0xff] }
 0x37d   :  { %v1562_v50 = vadd.f32 %v1530_v33, %v1498_v21  ;;  %v1863_v19 = vpop.f32.mrb[2].mxu1  ;;  %v1546_v21 = vld [vmem:[#allocation4 + $0x80] sm:$0xff] }
 0x37e   :  { %1595 = vst [vmem:[#allocation16 + $0x8] sm:$0xff] %v1563_v18  ;;  %v1501_v39 = vadd.f32 %v1863_v19, %v2974_v34  ;;  %v1243_v46 = vpop.f32.mrb[3].mxu1 }
 0x37f   :  { %1594 = vst [vmem:[#allocation16] sm:$0xff] %v1562_v50  ;;  %v1500_v35 = vadd.f32 %v2974_v34, %v1243_v46 }
 0x380   :  { %v1565_v3 = vadd.f32 %v1533_v59, %v1501_v39  ;;  %v1549_v39 = vld [vmem:[#allocation4 + $0x98] sm:$0xff] }
 0x381   :  { %v1564_v47 = vadd.f32 %v1532_v0, %v1500_v35  ;;  %v1866_v26 = vpop.f32.mrb[4].mxu1  ;;  %v1548_v35 = vld [vmem:[#allocation4 + $0x90] sm:$0xff] }
 0x382   :  { %1597 = vst [vmem:[#allocation16 + $0x18] sm:$0xff] %v1565_v3  ;;  %v1503_v27 = vadd.f32 %v1866_v26, %v2974_v34  ;;  %v1253_v52 = vpop.f32.mrb[5].mxu1 }
 0x383   :  { %1596 = vst [vmem:[#allocation16 + $0x10] sm:$0xff] %v1564_v47  ;;  %v1502_v30 = vadd.f32 %v2974_v34, %v1253_v52 }
 0x384   :  { %v1567_v45 = vadd.f32 %v1535_v43, %v1503_v27  ;;  %v1551_v27 = vld [vmem:[#allocation4 + $0xa8] sm:$0xff] }
 0x385   :  { %v1566_v5 = vadd.f32 %v1534_v1, %v1502_v30  ;;  %v1869_v53 = vpop.f32.mrb[6].mxu1  ;;  %v1550_v30 = vld [vmem:[#allocation4 + $0xa0] sm:$0xff] }
 0x386   :  { %1599 = vst [vmem:[#allocation16 + $0x28] sm:$0xff] %v1567_v45  ;;  %v1505_v54 = vadd.f32 %v1869_v53, %v2974_v34  ;;  %v1263_v15 = vpop.f32.mrb[7].mxu1 }
 0x387   :  { %1598 = vst [vmem:[#allocation16 + $0x20] sm:$0xff] %v1566_v5  ;;  %v1504_v57 = vadd.f32 %v2974_v34, %v1263_v15 }
 0x388   :  { %v1569_v60 = vadd.f32 %v1537_v7, %v1505_v54  ;;  %v1553_v54 = vld [vmem:[#allocation4 + $0xb8] sm:$0xff] }
 0x389   :  { %v1568_v28 = vadd.f32 %v1536_v20, %v1504_v57  ;;  %v1872_v29 = vpop.f32.mrb[8].mxu1  ;;  %v1552_v57 = vld [vmem:[#allocation4 + $0xb0] sm:$0xff] }
 0x38a   :  { %1601 = vst [vmem:[#allocation16 + $0x38] sm:$0xff] %v1569_v60  ;;  %v1507_v6 = vadd.f32 %v1872_v29, %v2974_v34  ;;  %v1273_v9 = vpop.f32.mrb[9].mxu1 }
 0x38b   :  { %1600 = vst [vmem:[#allocation16 + $0x30] sm:$0xff] %v1568_v28  ;;  %v1506_v42 = vadd.f32 %v2974_v34, %v1273_v9 }
 0x38c   :  { %v1571_v62 = vadd.f32 %v1539_v44, %v1507_v6  ;;  %v1555_v6 = vld [vmem:[#allocation4 + $0xc8] sm:$0xff] }
 0x38d   :  { %v1570_v14 = vadd.f32 %v1538_v58, %v1506_v42  ;;  %v1875_v11 = vpop.f32.mrb[10].mxu1  ;;  %v1554_v42 = vld [vmem:[#allocation4 + $0xc0] sm:$0xff] }
 0x38e   :  { %1603 = vst [vmem:[#allocation16 + $0x48] sm:$0xff] %v1571_v62  ;;  %v1509_v10 = vadd.f32 %v1875_v11, %v2974_v34  ;;  %v1283_v31 = vpop.f32.mrb[11].mxu1 }
 0x38f   :  { %1602 = vst [vmem:[#allocation16 + $0x40] sm:$0xff] %v1570_v14  ;;  %v1508_v22 = vadd.f32 %v2974_v34, %v1283_v31 }
 0x390   :  { %v1573_v23 = vadd.f32 %v1541_v63, %v1509_v10  ;;  %v1557_v10 = vld [vmem:[#allocation4 + $0xd8] sm:$0xff] }
 0x391   :  { %v1572_v4 = vadd.f32 %v1540_v55, %v1508_v22  ;;  %v1878_v16 = vpop.f32.mrb[12].mxu1  ;;  %v1556_v22 = vld [vmem:[#allocation4 + $0xd0] sm:$0xff] }
 0x392   :  { %1605 = vst [vmem:[#allocation16 + $0x58] sm:$0xff] %v1573_v23  ;;  %v1511_v61 = vadd.f32 %v1878_v16, %v2974_v34  ;;  %v1293_v51 = vpop.f32.mrb[13].mxu1 }
 0x393   :  { %1604 = vst [vmem:[#allocation16 + $0x50] sm:$0xff] %v1572_v4  ;;  %v1510_v36 = vadd.f32 %v2974_v34, %v1293_v51 }
 0x394   :  { %v1575_v37 = vadd.f32 %v1543_v56, %v1511_v61  ;;  %v1559_v61 = vld [vmem:[#allocation4 + $0xe8] sm:$0xff] }
 0x395   :  { %v1574_v8 = vadd.f32 %v1542_v40, %v1510_v36  ;;  %v1881_v32 = vpop.f32.mrb[14].mxu1  ;;  %v1558_v36 = vld [vmem:[#allocation4 + $0xe0] sm:$0xff] }
 0x396   :  { %1607 = vst [vmem:[#allocation16 + $0x68] sm:$0xff] %v1575_v37  ;;  %v1513_v41 = vadd.f32 %v1881_v32, %v2974_v34  ;;  %v1303_v2 = vpop.f32.mrb[15].mxu1 }
 0x397   :  { %1606 = vst [vmem:[#allocation16 + $0x60] sm:$0xff] %v1574_v8  ;;  %v1512_v48 = vadd.f32 %v2974_v34, %v1303_v2 }
 0x398   :  { %v1577_v24 = vadd.f32 %v1545_v38, %v1513_v41  ;;  %v1561_v41 = vld [vmem:[#allocation4 + $0xf8] sm:$0xff] }
 0x399   :  { %v1576_v25 = vadd.f32 %v1544_v17, %v1512_v48  ;;  %v1884_v12 = vpop.f32.mrb[16].mxu1  ;;  %v1560_v48 = vld [vmem:[#allocation4 + $0xf0] sm:$0xff] }
 0x39a   :  { %1609 = vst [vmem:[#allocation16 + $0x78] sm:$0xff] %v1577_v24  ;;  %v1515_v49 = vadd.f32 %v1884_v12, %v2974_v34  ;;  %v1313_v33 = vpop.f32.mrb[17].mxu1 }
 0x39b   :  { %1608 = vst [vmem:[#allocation16 + $0x70] sm:$0xff] %v1576_v25  ;;  %v1514_v18 = vadd.f32 %v2974_v34, %v1313_v33 }
 0x39c   :  { %v1579_v50 = vadd.f32 %v1547_v13, %v1515_v49 }
 0x39d   :  { %v1578_v19 = vadd.f32 %v1546_v21, %v1514_v18  ;;  %v1887_v59 = vpop.f32.mrb[18].mxu1 }
 0x39e   :  { %1611 = vst [vmem:[#allocation16 + $0x88] sm:$0xff] %v1579_v50  ;;  %v1517_v46 = vadd.f32 %v1887_v59, %v2974_v34  ;;  %v1323_v0 = vpop.f32.mrb[19].mxu1 }
 0x39f   :  { %1610 = vst [vmem:[#allocation16 + $0x80] sm:$0xff] %v1578_v19  ;;  %v1516_v3 = vadd.f32 %v2974_v34, %v1323_v0 }
 0x3a0   :  { %v1581_v47 = vadd.f32 %v1549_v39, %v1517_v46 }
 0x3a1   :  { %v1580_v26 = vadd.f32 %v1548_v35, %v1516_v3  ;;  %v1890_v43 = vpop.f32.mrb[20].mxu1 }
 0x3a2   :  { %1613 = vst [vmem:[#allocation16 + $0x98] sm:$0xff] %v1581_v47  ;;  %v1519_v52 = vadd.f32 %v1890_v43, %v2974_v34  ;;  %v1333_v1 = vpop.f32.mrb[21].mxu1 }
 0x3a3   :  { %1612 = vst [vmem:[#allocation16 + $0x90] sm:$0xff] %v1580_v26  ;;  %v1518_v45 = vadd.f32 %v2974_v34, %v1333_v1 }
 0x3a4   :  { %v1583_v5 = vadd.f32 %v1551_v27, %v1519_v52 }
 0x3a5   :  { %v1582_v53 = vadd.f32 %v1550_v30, %v1518_v45  ;;  %v1893_v7 = vpop.f32.mrb[22].mxu1 }
 0x3a6   :  { %1615 = vst [vmem:[#allocation16 + $0xa8] sm:$0xff] %v1583_v5  ;;  %v1521_v15 = vadd.f32 %v1893_v7, %v2974_v34  ;;  %v1343_v20 = vpop.f32.mrb[23].mxu1 }
 0x3a7   :  { %1614 = vst [vmem:[#allocation16 + $0xa0] sm:$0xff] %v1582_v53  ;;  %v1520_v60 = vadd.f32 %v2974_v34, %v1343_v20 }
 0x3a8   :  { %v1585_v28 = vadd.f32 %v1553_v54, %v1521_v15 }
 0x3a9   :  { %v1584_v29 = vadd.f32 %v1552_v57, %v1520_v60  ;;  %v1896_v44 = vpop.f32.mrb[24].mxu1 }
 0x3aa   :  { %1617 = vst [vmem:[#allocation16 + $0xb8] sm:$0xff] %v1585_v28  ;;  %v1523_v9 = vadd.f32 %v1896_v44, %v2974_v34  ;;  %v1353_v58 = vpop.f32.mrb[25].mxu1 }
 0x3ab   :  { %1616 = vst [vmem:[#allocation16 + $0xb0] sm:$0xff] %v1584_v29  ;;  %v1522_v62 = vadd.f32 %v2974_v34, %v1353_v58 }
 0x3ac   :  { %v1587_v14 = vadd.f32 %v1555_v6, %v1523_v9 }
 0x3ad   :  { %v1586_v11 = vadd.f32 %v1554_v42, %v1522_v62  ;;  %v1899_v63 = vpop.f32.mrb[26].mxu1 }
 0x3ae   :  { %1619 = vst [vmem:[#allocation16 + $0xc8] sm:$0xff] %v1587_v14  ;;  %v1525_v31 = vadd.f32 %v1899_v63, %v2974_v34  ;;  %v1363_v55 = vpop.f32.mrb[27].mxu1 }
 0x3af   :  { %1618 = vst [vmem:[#allocation16 + $0xc0] sm:$0xff] %v1586_v11  ;;  %v1524_v23 = vadd.f32 %v2974_v34, %v1363_v55 }
 0x3b0   :  { %v1589_v4 = vadd.f32 %v1557_v10, %v1525_v31 }
 0x3b1   :  { %v1588_v16 = vadd.f32 %v1556_v22, %v1524_v23  ;;  %v1902_v56 = vpop.f32.mrb[28].mxu1 }
 0x3b2   :  { %1621 = vst [vmem:[#allocation16 + $0xd8] sm:$0xff] %v1589_v4  ;;  %v1527_v51 = vadd.f32 %v1902_v56, %v2974_v34  ;;  %v1373_v40 = vpop.f32.mrb[29].mxu1 }
 0x3b3   :  { %1620 = vst [vmem:[#allocation16 + $0xd0] sm:$0xff] %v1588_v16  ;;  %v1526_v37 = vadd.f32 %v2974_v34, %v1373_v40 }
 0x3b4   :  { %v1591_v8 = vadd.f32 %v1559_v61, %v1527_v51 }
 0x3b5   :  { %v1590_v32 = vadd.f32 %v1558_v36, %v1526_v37  ;;  %v1905_v38 = vpop.f32.mrb[30].mxu1 }
 0x3b6   :  { %1623 = vst [vmem:[#allocation16 + $0xe8] sm:$0xff] %v1591_v8  ;;  %v1529_v2 = vadd.f32 %v1905_v38, %v2974_v34  ;;  %v1383_v17 = vpop.f32.mrb[31].mxu1 }
 0x3b7   :  { %1622 = vst [vmem:[#allocation16 + $0xe0] sm:$0xff] %v1590_v32  ;;  %v1528_v24 = vadd.f32 %v2974_v34, %v1383_v17 }
 0x3b8   :  { %v1593_v25 = vadd.f32 %v1561_v41, %v1529_v2 }
 0x3b9   :  { %v1592_v12 = vadd.f32 %v1560_v48, %v1528_v24 }
 0x3ba   :  { %1625 = vst [vmem:[#allocation16 + $0xf8] sm:$0xff] %v1593_v25 }
 0x3bb   :  { %1624 = vst [vmem:[#allocation16 + $0xf0] sm:$0xff] %v1592_v12 }
 0x3bc   :  { %2273 = shalt.err (!%p2270_p4)
}
 0x3bd   :  { %s2274_s20 = scalar_lea.hbm %s3030_s7, 4096 }
 0x3be   :  { %p2275_p5 = scmp.ne.s32.totalorder %s3030_s7, %s2274_s20  ;;  %p2278_p6 = scmp.lt.u32.totalorder %s2274_s20, %s3030_s7 }
 0x3c0   :  { %p2280_p7 = pnand %p2278_p6, %p2275_p5 }
 0x3c2   :  { %2283 = shalt.err (!%p2280_p7)
}
 0x3c3   :  { %1637 = dma.vmem_to_hbm [thread:$0]  %s1632_s14, 4096, %s3030_s7, [#allocation6], %s2297_s25, %s2297_s25, %s2298_s26  }
 0x3c4   :  { %2292 = dma.done.wait [#allocation6], 4096  }
 0x3c5   :  { %2293 = vsyncadd [#allocation6], 4294963200 }
 0x3c6   :  { %1641 = vsyncpa [#allocation5], 1 }
 0x3c7   :  { %1642 = vsyncpa [#allocation8], 1 }
 0x3c8   :  { %1643 = vsyncpa [#allocation11], 1 }
 0x3c9   :  { %1644 = vsyncpa [#allocation14], 1 }
 0x3ca   :  { %1645 = vsyncpa [#allocation6], 1 }

</bundles_post_ra>
